<compile_context>
chip_gen: v7x
topology: tpu7x:2x2x1
jax: 0.10.0
libtpu: 0.0.40
codegen_flags: <defaults>
</compile_context>

<pallas_src>
import functools
import math

import jax
import jax.numpy as jnp
from jax.experimental import pallas as pl
from jax.experimental.pallas import tpu as pltpu


# ----------------------------------------------------------------------------
# Pallas kernel: one (direction, time-chunk) grid step of the LSTM recurrence.
# gx already contains x @ W_ih^T + (b_ih + b_hh) for every timestep.
# ----------------------------------------------------------------------------
def _lstm_dir_kernel(lens_ref, gx_ref, whh_ref, y_ref, hfin_ref, h_scr, c_scr,
                     *, hh, tc, t_pad):
    d = pl.program_id(0)          # 0 = forward, 1 = backward
    c_idx = pl.program_id(1)      # time-chunk index within this direction
    n_chunks = pl.num_programs(1)

    @pl.when(c_idx == 0)
    def _():
        h_scr[...] = jnp.zeros_like(h_scr)
        c_scr[...] = jnp.zeros_like(c_scr)

    lens = lens_ref[...]          # (Bp, 1) int32, resident
    whh = whh_ref[0]              # (Hh, 4*Hh), resident per direction

    # first global timestep covered by this chunk (natural time order)
    chunk_base = jnp.where(d == 0, c_idx * tc, t_pad - (c_idx + 1) * tc)

    @pl.loop(0, tc, unroll=True)
    def _(j):
        # within-chunk row: forward walks 0..tc-1, backward walks tc-1..0
        local = j + d * (tc - 1 - 2 * j)
        t_glob = chunk_base + local

        h_prev = h_scr[...]
        c_prev = c_scr[...]

        gates = gx_ref[0, local] + jnp.dot(
            h_prev, whh, preferred_element_type=jnp.float32)  # (Bp, 4*Hh)

        # PyTorch gate order: i, f, g, o.
        # NOTE: for production sizes make Hh a multiple of 128 so these slices
        # are lane-tile aligned.
        i_g = jax.nn.sigmoid(gates[:, 0 * hh:1 * hh])
        f_g = jax.nn.sigmoid(gates[:, 1 * hh:2 * hh])
        g_g = jnp.tanh(gates[:, 2 * hh:3 * hh])
        o_g = jax.nn.sigmoid(gates[:, 3 * hh:4 * hh])

        c_new = f_g * c_prev + i_g * g_g
        h_new = o_g * jnp.tanh(c_new)

        valid = lens > t_glob      # (Bp, 1): pack_padded_sequence semantics
        h_scr[...] = jnp.where(valid, h_new, h_prev)
        c_scr[...] = jnp.where(valid, c_new, c_prev)
        y_ref[0, local] = jnp.where(valid, h_new, 0.0)   # padded steps -> 0

    # Only the very last chunk of each direction holds the final hidden state.
    @pl.when(c_idx == n_chunks - 1)
    def _():
        hfin_ref[0] = h_scr[...]


def _bilstm_layer_recurrence(gx, whh_t, lens_col, *, tc):
    """Fused fwd+bwd recurrence for one layer.

    gx:       (2, T_pad, Bp, 4*Hh) precomputed input pre-activations (+bias)
    whh_t:    (2, Hh, 4*Hh) recurrent weights (transposed)
    lens_col: (Bp, 1) int32 valid lengths
    returns y (2, T_pad, Bp, Hh) in natural time order, hfin (2, Bp, Hh).
    """
    _, t_pad, bp, g4 = gx.shape
    hh = g4 // 4
    n_chunks = t_pad // tc

    kernel = functools.partial(_lstm_dir_kernel, hh=hh, tc=tc, t_pad=t_pad)

    # Backward direction reads/writes time blocks in reverse via the index_map
    # (no jnp.flip / HBM copies): block index = c (fwd) or n_chunks-1-c (bwd).
    def time_map(d_, c_):
        return (d_, c_ + d_ * (n_chunks - 1 - 2 * c_), 0, 0)

    y, hfin = pl.pallas_call(
        kernel,
        grid=(2, n_chunks),
        in_specs=[
            pl.BlockSpec((bp, 1), lambda d_, c_: (0, 0)),            # lens (resident)
            pl.BlockSpec((1, tc, bp, g4), time_map),                 # gx chunk
            pl.BlockSpec((1, hh, g4), lambda d_, c_: (d_, 0, 0)),    # W_hh^T (resident)
        ],
        out_specs=(
            pl.BlockSpec((1, tc, bp, hh), time_map),                 # y chunk
            pl.BlockSpec((1, bp, hh), lambda d_, c_: (d_, 0, 0)),    # final h
        ),
        out_shape=(
            jax.ShapeDtypeStruct((2, t_pad, bp, hh), jnp.float32),
            jax.ShapeDtypeStruct((2, bp, hh), jnp.float32),
        ),
        scratch_shapes=[
            pltpu.VMEM((bp, hh), jnp.float32),   # h carry
            pltpu.VMEM((bp, hh), jnp.float32),   # c carry
        ],
        compiler_params=pltpu.CompilerParams(
            # direction axis is independent (2 TCs on v7x); time is a recurrence
            dimension_semantics=("parallel", "arbitrary")),
    )(lens_col, gx, whh_t)
    return y, hfin


# ----------------------------------------------------------------------------
# Parameters (PyTorch nn.LSTM-style init, biases folded)
# ----------------------------------------------------------------------------
def init_bilstm_params(key, nhid, num_layers):
    hh = nhid // 2
    bound = 1.0 / math.sqrt(hh)
    params = []
    for _layer in range(num_layers):
        in_size = nhid  # layer 0: nhid; deeper layers: 2*hh == nhid
        wih_l, whh_l, b_l = [], [], []
        for _d in range(2):
            key, k0, k1, k2, k3 = jax.random.split(key, 5)
            wih_l.append(jax.random.uniform(k0, (4 * hh, in_size), jnp.float32,
                                            -bound, bound))
            whh_l.append(jax.random.uniform(k1, (4 * hh, hh), jnp.float32,
                                            -bound, bound))
            bih = jax.random.uniform(k2, (4 * hh,), jnp.float32, -bound, bound)
            bhh = jax.random.uniform(k3, (4 * hh,), jnp.float32, -bound, bound)
            b_l.append(bih + bhh)
        params.append({"wih": jnp.stack(wih_l),   # (2, 4Hh, in)
                       "whh": jnp.stack(whh_l),   # (2, 4Hh, Hh)
                       "b": jnp.stack(b_l)})      # (2, 4Hh)
    return params


def _pad_split(h, length):
    """Equivalent of pad(_h.split(length), out_type='tensor')."""
    max_len = max(length)
    chunks, idx = [], 0
    for n in length:
        c = h[idx:idx + n]
        c = jnp.pad(c, ((0, max_len - n), (0, 0)))
        chunks.append(c)
        idx += n
    return jnp.stack(chunks)


# ----------------------------------------------------------------------------
# BiLSTM module forward (enc_type='ent')
# ----------------------------------------------------------------------------
def bilstm_forward(inp, mask, length, params, *, time_chunk=8):
    """inp: (B, T, nhid) float32; mask: (B, T) with 0 == valid token.
    length: python list of ints summing to B."""
    # TODO(synk): nn.Dropout(emb_drop) treated as identity (inference mode).
    B, T, nhid = inp.shape
    hh = nhid // 2

    lens = (mask == 0).sum(-1).astype(jnp.int32)                 # (B,)

    # Align batch to sublanes (8) and time to the chunk size.
    bp = -(-B // 8) * 8
    tc = min(time_chunk, T)
    t_pad = -(-T // tc) * tc

    x_tm = jnp.transpose(inp, (1, 0, 2)).astype(jnp.float32)     # (T, B, nhid)
    x_tm = jnp.pad(x_tm, ((0, t_pad - T), (0, bp - B), (0, 0)))  # (T_pad, Bp, nhid)
    lens_col = jnp.pad(lens, (0, bp - B))[:, None]               # (Bp, 1)

    y = None
    hfin = None
    for li, p in enumerate(params):
        wih, whh, b = p["wih"], p["whh"], p["b"]
        whh_t = jnp.transpose(whh, (0, 2, 1))                    # (2, Hh, 4Hh)
        if li == 0:
            # Hoisted input projection: one large time-parallel matmul.
            gx = jnp.einsum("tbi,dgi->dtbg", x_tm, wih) + b[:, None, None, :]
        else:
            # Consume previous layer's (2, T, Bp, Hh) output directly via a
            # split-weight einsum (no concatenate / HBM copy).
            wih_r = wih.reshape(2, 4 * hh, 2, hh)                # (d, g, prev-dir, h)
            gx = jnp.einsum("ptbh,dgph->dtbg", y, wih_r) + b[:, None, None, :]
        y, hfin = _bilstm_layer_recurrence(gx, whh_t, lens_col, tc=tc)

    # _h.transpose(0,1)[:, -2:].view(B, -1) == concat(last-layer fwd, bwd) hidden
    h_last = jnp.concatenate([hfin[0, :B], hfin[1, :B]], axis=-1)  # (B, nhid)
    return _pad_split(h_last, length)


# ----------------------------------------------------------------------------
if __name__ == "__main__":
    B, T, NHID, NUM_LAYERS = 4, 8, 32, 2

    key = jax.random.PRNGKey(0)
    k_inp, k_par = jax.random.split(key)

    inp = jax.random.normal(k_inp, (B, T, NHID), jnp.float32)

    # mask: 0 marks a real token; lens per sequence = [8, 5, 7, 3]
    lens = jnp.array([8, 5, 7, 3], dtype=jnp.int32)
    mask = (jnp.arange(T)[None, :] >= lens[:, None]).astype(jnp.int32)  # (B, T)

    length = [3, 1]   # split 4 sequence encodings into 2 groups, then pad

    params = init_bilstm_params(k_par, NHID, NUM_LAYERS)

    out = bilstm_forward(inp, mask, length, params)
    out = jax.block_until_ready(out)
    assert out.shape == (len(length), max(length), NHID)
    print("KERNEL_OK")
</pallas_src>

<mosaic_0001>
module attributes {stable_mosaic.version = 11 : i64} {
  func.func @_lstm_dir_kernel(%arg0: i32, %arg1: i32, %arg2: memref<8x1xi32, #tpu.memory_space<vmem>>, %arg3: memref<1x8x8x64xf32, #tpu.memory_space<vmem>>, %arg4: memref<1x16x64xf32, #tpu.memory_space<vmem>>, %arg5: memref<1x8x8x16xf32, #tpu.memory_space<vmem>>, %arg6: memref<1x8x16xf32, #tpu.memory_space<vmem>>, %arg7: memref<8x16xf32, #tpu.memory_space<vmem>>, %arg8: memref<8x16xf32, #tpu.memory_space<vmem>>) attributes {dimension_semantics = [#tpu.dimension_semantics<parallel>, #tpu.dimension_semantics<arbitrary>], iteration_bounds = array<i64: 2, 1>, scalar_prefetch = 0 : i64, scratch_operands = 2 : i64, tpu.core_type = #tpu.core_type<tc>, window_params = [{pipeline_mode = #tpu.pipeline_mode<synchronous>, transform_indices = @transform_0, window_bounds = array<i64: 8, 1>}, {transform_indices = @transform_1, window_bounds = array<i64: 1, 8, 8, 64>}, {transform_indices = @transform_2, window_bounds = array<i64: 1, 16, 64>}, {transform_indices = @transform_3, window_bounds = array<i64: 1, 8, 8, 16>}, {transform_indices = @transform_4, window_bounds = array<i64: 1, 8, 16>}]} {
    %c0_i32 = arith.constant 0 : i32
    %0 = arith.cmpi eq, %arg1, %c0_i32 : i32
    %1 = arith.extui %0 : i1 to i32
    %c0_i32_0 = arith.constant 0 : i32
    %2 = arith.cmpi ne, %1, %c0_i32_0 : i32
    scf.if %2 {
      %cst_196 = arith.constant 0.000000e+00 : f32
      %471 = vector.broadcast %cst_196 : f32 to vector<8x16xf32>
      %c0_197 = arith.constant 0 : index
      %c0_198 = arith.constant 0 : index
      %472 = vector.load %arg7[%c0_197, %c0_198] : memref<8x16xf32, #tpu.memory_space<vmem>>, vector<8x16xf32>
      tpu.vector_store %arg7[%c0_197, %c0_198], %471 {strides = array<i32>} : memref<8x16xf32, #tpu.memory_space<vmem>>, vector<8x16xf32>,
      %cst_199 = arith.constant 0.000000e+00 : f32
      %473 = vector.broadcast %cst_199 : f32 to vector<8x16xf32>
      %c0_200 = arith.constant 0 : index
      %c0_201 = arith.constant 0 : index
      %474 = vector.load %arg8[%c0_200, %c0_201] : memref<8x16xf32, #tpu.memory_space<vmem>>, vector<8x16xf32>
      tpu.vector_store %arg8[%c0_200, %c0_201], %473 {strides = array<i32>} : memref<8x16xf32, #tpu.memory_space<vmem>>, vector<8x16xf32>,
    } else {
    }
    %c0 = arith.constant 0 : index
    %c0_1 = arith.constant 0 : index
    %3 = vector.load %arg2[%c0, %c0_1] : memref<8x1xi32, #tpu.memory_space<vmem>>, vector<8x1xi32>
    %c0_2 = arith.constant 0 : index
    %c0_3 = arith.constant 0 : index
    %c0_4 = arith.constant 0 : index
    %4 = vector.load %arg4[%c0_2, %c0_3, %c0_4] : memref<1x16x64xf32, #tpu.memory_space<vmem>>, vector<1x16x64xf32>
    %5 = vector.shape_cast %4 : vector<1x16x64xf32> to vector<16x64xf32>
    %c0_i32_5 = arith.constant 0 : i32
    %6 = arith.cmpi eq, %arg0, %c0_i32_5 : i32
    %c8_i32 = arith.constant 8 : i32
    %7 = arith.muli %arg1, %c8_i32 : i32
    %c1_i32 = arith.constant 1 : i32
    %8 = arith.addi %arg1, %c1_i32 : i32
    %c8_i32_6 = arith.constant 8 : i32
    %9 = arith.muli %8, %c8_i32_6 : i32
    %c8_i32_7 = arith.constant 8 : i32
    %10 = arith.subi %c8_i32_7, %9 : i32
    %11 = arith.select %6, %7, %10 : i32
    %c0_i32_8 = arith.constant 0 : i32
    %c1_i32_9 = arith.constant 1 : i32
    %12 = arith.muli %c0_i32_8, %c1_i32_9 : i32
    %c0_i32_10 = arith.constant 0 : i32
    %13 = arith.addi %c0_i32_10, %12 : i32
    %c2_i32 = arith.constant 2 : i32
    %14 = arith.muli %c2_i32, %13 : i32
    %c7_i32 = arith.constant 7 : i32
    %15 = arith.subi %c7_i32, %14 : i32
    %16 = arith.muli %arg0, %15 : i32
    %17 = arith.addi %13, %16 : i32
    %18 = arith.addi %11, %17 : i32
    %c0_11 = arith.constant 0 : index
    %c0_12 = arith.constant 0 : index
    %19 = vector.load %arg7[%c0_11, %c0_12] : memref<8x16xf32, #tpu.memory_space<vmem>>, vector<8x16xf32>
    %c0_13 = arith.constant 0 : index
    %c0_14 = arith.constant 0 : index
    %20 = vector.load %arg8[%c0_13, %c0_14] : memref<8x16xf32, #tpu.memory_space<vmem>>, vector<8x16xf32>
    %c0_15 = arith.constant 0 : index
    %21 = arith.index_cast %17 : i32 to index
    %c0_16 = arith.constant 0 : index
    %c0_17 = arith.constant 0 : index
    %22 = vector.load %arg3[%c0_15, %21, %c0_16, %c0_17] : memref<1x8x8x64xf32, #tpu.memory_space<vmem>>, vector<1x1x8x64xf32>
    %23 = vector.shape_cast %22 : vector<1x1x8x64xf32> to vector<8x64xf32>
    %cst = arith.constant dense<0.000000e+00> : vector<8x64xf32>
    %24 = tpu.matmul %19, %5, %cst {dimension_numbers = #tpu.dot_dimension_numbers<[1], [0], [0], [1], [0, 0, 1, 1], [], []>} : vector<8x16xf32>, vector<16x64xf32>, vector<8x64xf32> -> vector<8x64xf32>
    %25 = arith.addf %23, %24 : vector<8x64xf32>
    %26 = vector.extract_strided_slice %25 {offsets = [0, 0], sizes = [8, 16], strides = [1, 1]} : vector<8x64xf32> to vector<8x16xf32>
    %27 = arith.negf %26 : vector<8x16xf32>
    %28 = math.exp %27 : vector<8x16xf32>
    %cst_18 = arith.constant 1.000000e+00 : f32
    %29 = vector.broadcast %cst_18 : f32 to vector<8x16xf32>
    %30 = arith.addf %29, %28 : vector<8x16xf32>
    %31 = arith.divf %29, %30 : vector<8x16xf32>
    %32 = vector.extract_strided_slice %25 {offsets = [0, 16], sizes = [8, 16], strides = [1, 1]} : vector<8x64xf32> to vector<8x16xf32>
    %33 = arith.negf %32 : vector<8x16xf32>
    %34 = math.exp %33 : vector<8x16xf32>
    %cst_19 = arith.constant 1.000000e+00 : f32
    %35 = vector.broadcast %cst_19 : f32 to vector<8x16xf32>
    %36 = arith.addf %35, %34 : vector<8x16xf32>
    %37 = arith.divf %35, %36 : vector<8x16xf32>
    %38 = vector.extract_strided_slice %25 {offsets = [0, 32], sizes = [8, 16], strides = [1, 1]} : vector<8x64xf32> to vector<8x16xf32>
    %39 = math.tanh %38 : vector<8x16xf32>
    %40 = vector.extract_strided_slice %25 {offsets = [0, 48], sizes = [8, 16], strides = [1, 1]} : vector<8x64xf32> to vector<8x16xf32>
    %41 = arith.negf %40 : vector<8x16xf32>
    %42 = math.exp %41 : vector<8x16xf32>
    %cst_20 = arith.constant 1.000000e+00 : f32
    %43 = vector.broadcast %cst_20 : f32 to vector<8x16xf32>
    %44 = arith.addf %43, %42 : vector<8x16xf32>
    %45 = arith.divf %43, %44 : vector<8x16xf32>
    %46 = arith.mulf %37, %20 : vector<8x16xf32>
    %47 = arith.mulf %31, %39 : vector<8x16xf32>
    %48 = arith.addf %46, %47 : vector<8x16xf32>
    %49 = math.tanh %48 : vector<8x16xf32>
    %50 = arith.mulf %45, %49 : vector<8x16xf32>
    %51 = vector.broadcast %18 : i32 to vector<8x1xi32>
    %52 = arith.cmpi sgt, %3, %51 : vector<8x1xi32>
    %53 = vector.shape_cast %52 : vector<8x1xi1> to vector<8x1xi1>
    %54 = vector.broadcast %53 : vector<8x1xi1> to vector<8x16xi1>
    %55 = arith.select %54, %50, %19 : vector<8x16xi1>, vector<8x16xf32>
    %c0_21 = arith.constant 0 : index
    %c0_22 = arith.constant 0 : index
    %56 = vector.load %arg7[%c0_21, %c0_22] : memref<8x16xf32, #tpu.memory_space<vmem>>, vector<8x16xf32>
    tpu.vector_store %arg7[%c0_21, %c0_22], %55 {strides = array<i32>} : memref<8x16xf32, #tpu.memory_space<vmem>>, vector<8x16xf32>,
    %57 = vector.shape_cast %52 : vector<8x1xi1> to vector<8x1xi1>
    %58 = vector.broadcast %57 : vector<8x1xi1> to vector<8x16xi1>
    %59 = arith.select %58, %48, %20 : vector<8x16xi1>, vector<8x16xf32>
    %c0_23 = arith.constant 0 : index
    %c0_24 = arith.constant 0 : index
    %60 = vector.load %arg8[%c0_23, %c0_24] : memref<8x16xf32, #tpu.memory_space<vmem>>, vector<8x16xf32>
    tpu.vector_store %arg8[%c0_23, %c0_24], %59 {strides = array<i32>} : memref<8x16xf32, #tpu.memory_space<vmem>>, vector<8x16xf32>,
    %cst_25 = arith.constant 0.000000e+00 : f32
    %61 = vector.shape_cast %52 : vector<8x1xi1> to vector<8x1xi1>
    %62 = vector.broadcast %61 : vector<8x1xi1> to vector<8x16xi1>
    %63 = vector.broadcast %cst_25 : f32 to vector<8x16xf32>
    %64 = arith.select %62, %50, %63 : vector<8x16xi1>, vector<8x16xf32>
    %c0_26 = arith.constant 0 : index
    %65 = arith.index_cast %17 : i32 to index
    %c0_27 = arith.constant 0 : index
    %c0_28 = arith.constant 0 : index
    %66 = vector.load %arg5[%c0_26, %65, %c0_27, %c0_28] : memref<1x8x8x16xf32, #tpu.memory_space<vmem>>, vector<1x1x8x16xf32>
    %67 = vector.shape_cast %66 : vector<1x1x8x16xf32> to vector<8x16xf32>
    %68 = vector.shape_cast %64 : vector<8x16xf32> to vector<1x1x8x16xf32>
    tpu.vector_store %arg5[%c0_26, %65, %c0_27, %c0_28], %68 {strides = array<i32>} : memref<1x8x8x16xf32, #tpu.memory_space<vmem>>, vector<1x1x8x16xf32>,
    %c1_i32_29 = arith.constant 1 : i32
    %c1_i32_30 = arith.constant 1 : i32
    %69 = arith.muli %c1_i32_29, %c1_i32_30 : i32
    %c0_i32_31 = arith.constant 0 : i32
    %70 = arith.addi %c0_i32_31, %69 : i32
    %c2_i32_32 = arith.constant 2 : i32
    %71 = arith.muli %c2_i32_32, %70 : i32
    %c7_i32_33 = arith.constant 7 : i32
    %72 = arith.subi %c7_i32_33, %71 : i32
    %73 = arith.muli %arg0, %72 : i32
    %74 = arith.addi %70, %73 : i32
    %75 = arith.addi %11, %74 : i32
    %c0_34 = arith.constant 0 : index
    %c0_35 = arith.constant 0 : index
    %76 = vector.load %arg7[%c0_34, %c0_35] : memref<8x16xf32, #tpu.memory_space<vmem>>, vector<8x16xf32>
    %c0_36 = arith.constant 0 : index
    %c0_37 = arith.constant 0 : index
    %77 = vector.load %arg8[%c0_36, %c0_37] : memref<8x16xf32, #tpu.memory_space<vmem>>, vector<8x16xf32>
    %c0_38 = arith.constant 0 : index
    %78 = arith.index_cast %74 : i32 to index
    %c0_39 = arith.constant 0 : index
    %c0_40 = arith.constant 0 : index
    %79 = vector.load %arg3[%c0_38, %78, %c0_39, %c0_40] : memref<1x8x8x64xf32, #tpu.memory_space<vmem>>, vector<1x1x8x64xf32>
    %80 = vector.shape_cast %79 : vector<1x1x8x64xf32> to vector<8x64xf32>
    %cst_41 = arith.constant dense<0.000000e+00> : vector<8x64xf32>
    %81 = tpu.matmul %76, %5, %cst_41 {dimension_numbers = #tpu.dot_dimension_numbers<[1], [0], [0], [1], [0, 0, 1, 1], [], []>} : vector<8x16xf32>, vector<16x64xf32>, vector<8x64xf32> -> vector<8x64xf32>
    %82 = arith.addf %80, %81 : vector<8x64xf32>
    %83 = vector.extract_strided_slice %82 {offsets = [0, 0], sizes = [8, 16], strides = [1, 1]} : vector<8x64xf32> to vector<8x16xf32>
    %84 = arith.negf %83 : vector<8x16xf32>
    %85 = math.exp %84 : vector<8x16xf32>
    %cst_42 = arith.constant 1.000000e+00 : f32
    %86 = vector.broadcast %cst_42 : f32 to vector<8x16xf32>
    %87 = arith.addf %86, %85 : vector<8x16xf32>
    %88 = arith.divf %86, %87 : vector<8x16xf32>
    %89 = vector.extract_strided_slice %82 {offsets = [0, 16], sizes = [8, 16], strides = [1, 1]} : vector<8x64xf32> to vector<8x16xf32>
    %90 = arith.negf %89 : vector<8x16xf32>
    %91 = math.exp %90 : vector<8x16xf32>
    %cst_43 = arith.constant 1.000000e+00 : f32
    %92 = vector.broadcast %cst_43 : f32 to vector<8x16xf32>
    %93 = arith.addf %92, %91 : vector<8x16xf32>
    %94 = arith.divf %92, %93 : vector<8x16xf32>
    %95 = vector.extract_strided_slice %82 {offsets = [0, 32], sizes = [8, 16], strides = [1, 1]} : vector<8x64xf32> to vector<8x16xf32>
    %96 = math.tanh %95 : vector<8x16xf32>
    %97 = vector.extract_strided_slice %82 {offsets = [0, 48], sizes = [8, 16], strides = [1, 1]} : vector<8x64xf32> to vector<8x16xf32>
    %98 = arith.negf %97 : vector<8x16xf32>
    %99 = math.exp %98 : vector<8x16xf32>
    %cst_44 = arith.constant 1.000000e+00 : f32
    %100 = vector.broadcast %cst_44 : f32 to vector<8x16xf32>
    %101 = arith.addf %100, %99 : vector<8x16xf32>
    %102 = arith.divf %100, %101 : vector<8x16xf32>
    %103 = arith.mulf %94, %77 : vector<8x16xf32>
    %104 = arith.mulf %88, %96 : vector<8x16xf32>
    %105 = arith.addf %103, %104 : vector<8x16xf32>
    %106 = math.tanh %105 : vector<8x16xf32>
    %107 = arith.mulf %102, %106 : vector<8x16xf32>
    %108 = vector.broadcast %75 : i32 to vector<8x1xi32>
    %109 = arith.cmpi sgt, %3, %108 : vector<8x1xi32>
    %110 = vector.shape_cast %109 : vector<8x1xi1> to vector<8x1xi1>
    %111 = vector.broadcast %110 : vector<8x1xi1> to vector<8x16xi1>
    %112 = arith.select %111, %107, %76 : vector<8x16xi1>, vector<8x16xf32>
    %c0_45 = arith.constant 0 : index
    %c0_46 = arith.constant 0 : index
    %113 = vector.load %arg7[%c0_45, %c0_46] : memref<8x16xf32, #tpu.memory_space<vmem>>, vector<8x16xf32>
    tpu.vector_store %arg7[%c0_45, %c0_46], %112 {strides = array<i32>} : memref<8x16xf32, #tpu.memory_space<vmem>>, vector<8x16xf32>,
    %114 = vector.shape_cast %109 : vector<8x1xi1> to vector<8x1xi1>
    %115 = vector.broadcast %114 : vector<8x1xi1> to vector<8x16xi1>
    %116 = arith.select %115, %105, %77 : vector<8x16xi1>, vector<8x16xf32>
    %c0_47 = arith.constant 0 : index
    %c0_48 = arith.constant 0 : index
    %117 = vector.load %arg8[%c0_47, %c0_48] : memref<8x16xf32, #tpu.memory_space<vmem>>, vector<8x16xf32>
    tpu.vector_store %arg8[%c0_47, %c0_48], %116 {strides = array<i32>} : memref<8x16xf32, #tpu.memory_space<vmem>>, vector<8x16xf32>,
    %cst_49 = arith.constant 0.000000e+00 : f32
    %118 = vector.shape_cast %109 : vector<8x1xi1> to vector<8x1xi1>
    %119 = vector.broadcast %118 : vector<8x1xi1> to vector<8x16xi1>
    %120 = vector.broadcast %cst_49 : f32 to vector<8x16xf32>
    %121 = arith.select %119, %107, %120 : vector<8x16xi1>, vector<8x16xf32>
    %c0_50 = arith.constant 0 : index
    %122 = arith.index_cast %74 : i32 to index
    %c0_51 = arith.constant 0 : index
    %c0_52 = arith.constant 0 : index
    %123 = vector.load %arg5[%c0_50, %122, %c0_51, %c0_52] : memref<1x8x8x16xf32, #tpu.memory_space<vmem>>, vector<1x1x8x16xf32>
    %124 = vector.shape_cast %123 : vector<1x1x8x16xf32> to vector<8x16xf32>
    %125 = vector.shape_cast %121 : vector<8x16xf32> to vector<1x1x8x16xf32>
    tpu.vector_store %arg5[%c0_50, %122, %c0_51, %c0_52], %125 {strides = array<i32>} : memref<1x8x8x16xf32, #tpu.memory_space<vmem>>, vector<1x1x8x16xf32>,
    %c2_i32_53 = arith.constant 2 : i32
    %c1_i32_54 = arith.constant 1 : i32
    %126 = arith.muli %c2_i32_53, %c1_i32_54 : i32
    %c0_i32_55 = arith.constant 0 : i32
    %127 = arith.addi %c0_i32_55, %126 : i32
    %c2_i32_56 = arith.constant 2 : i32
    %128 = arith.muli %c2_i32_56, %127 : i32
    %c7_i32_57 = arith.constant 7 : i32
    %129 = arith.subi %c7_i32_57, %128 : i32
    %130 = arith.muli %arg0, %129 : i32
    %131 = arith.addi %127, %130 : i32
    %132 = arith.addi %11, %131 : i32
    %c0_58 = arith.constant 0 : index
    %c0_59 = arith.constant 0 : index
    %133 = vector.load %arg7[%c0_58, %c0_59] : memref<8x16xf32, #tpu.memory_space<vmem>>, vector<8x16xf32>
    %c0_60 = arith.constant 0 : index
    %c0_61 = arith.constant 0 : index
    %134 = vector.load %arg8[%c0_60, %c0_61] : memref<8x16xf32, #tpu.memory_space<vmem>>, vector<8x16xf32>
    %c0_62 = arith.constant 0 : index
    %135 = arith.index_cast %131 : i32 to index
    %c0_63 = arith.constant 0 : index
    %c0_64 = arith.constant 0 : index
    %136 = vector.load %arg3[%c0_62, %135, %c0_63, %c0_64] : memref<1x8x8x64xf32, #tpu.memory_space<vmem>>, vector<1x1x8x64xf32>
    %137 = vector.shape_cast %136 : vector<1x1x8x64xf32> to vector<8x64xf32>
    %cst_65 = arith.constant dense<0.000000e+00> : vector<8x64xf32>
    %138 = tpu.matmul %133, %5, %cst_65 {dimension_numbers = #tpu.dot_dimension_numbers<[1], [0], [0], [1], [0, 0, 1, 1], [], []>} : vector<8x16xf32>, vector<16x64xf32>, vector<8x64xf32> -> vector<8x64xf32>
    %139 = arith.addf %137, %138 : vector<8x64xf32>
    %140 = vector.extract_strided_slice %139 {offsets = [0, 0], sizes = [8, 16], strides = [1, 1]} : vector<8x64xf32> to vector<8x16xf32>
    %141 = arith.negf %140 : vector<8x16xf32>
    %142 = math.exp %141 : vector<8x16xf32>
    %cst_66 = arith.constant 1.000000e+00 : f32
    %143 = vector.broadcast %cst_66 : f32 to vector<8x16xf32>
    %144 = arith.addf %143, %142 : vector<8x16xf32>
    %145 = arith.divf %143, %144 : vector<8x16xf32>
    %146 = vector.extract_strided_slice %139 {offsets = [0, 16], sizes = [8, 16], strides = [1, 1]} : vector<8x64xf32> to vector<8x16xf32>
    %147 = arith.negf %146 : vector<8x16xf32>
    %148 = math.exp %147 : vector<8x16xf32>
    %cst_67 = arith.constant 1.000000e+00 : f32
    %149 = vector.broadcast %cst_67 : f32 to vector<8x16xf32>
    %150 = arith.addf %149, %148 : vector<8x16xf32>
    %151 = arith.divf %149, %150 : vector<8x16xf32>
    %152 = vector.extract_strided_slice %139 {offsets = [0, 32], sizes = [8, 16], strides = [1, 1]} : vector<8x64xf32> to vector<8x16xf32>
    %153 = math.tanh %152 : vector<8x16xf32>
    %154 = vector.extract_strided_slice %139 {offsets = [0, 48], sizes = [8, 16], strides = [1, 1]} : vector<8x64xf32> to vector<8x16xf32>
    %155 = arith.negf %154 : vector<8x16xf32>
    %156 = math.exp %155 : vector<8x16xf32>
    %cst_68 = arith.constant 1.000000e+00 : f32
    %157 = vector.broadcast %cst_68 : f32 to vector<8x16xf32>
    %158 = arith.addf %157, %156 : vector<8x16xf32>
    %159 = arith.divf %157, %158 : vector<8x16xf32>
    %160 = arith.mulf %151, %134 : vector<8x16xf32>
    %161 = arith.mulf %145, %153 : vector<8x16xf32>
    %162 = arith.addf %160, %161 : vector<8x16xf32>
    %163 = math.tanh %162 : vector<8x16xf32>
    %164 = arith.mulf %159, %163 : vector<8x16xf32>
    %165 = vector.broadcast %132 : i32 to vector<8x1xi32>
    %166 = arith.cmpi sgt, %3, %165 : vector<8x1xi32>
    %167 = vector.shape_cast %166 : vector<8x1xi1> to vector<8x1xi1>
    %168 = vector.broadcast %167 : vector<8x1xi1> to vector<8x16xi1>
    %169 = arith.select %168, %164, %133 : vector<8x16xi1>, vector<8x16xf32>
    %c0_69 = arith.constant 0 : index
    %c0_70 = arith.constant 0 : index
    %170 = vector.load %arg7[%c0_69, %c0_70] : memref<8x16xf32, #tpu.memory_space<vmem>>, vector<8x16xf32>
    tpu.vector_store %arg7[%c0_69, %c0_70], %169 {strides = array<i32>} : memref<8x16xf32, #tpu.memory_space<vmem>>, vector<8x16xf32>,
    %171 = vector.shape_cast %166 : vector<8x1xi1> to vector<8x1xi1>
    %172 = vector.broadcast %171 : vector<8x1xi1> to vector<8x16xi1>
    %173 = arith.select %172, %162, %134 : vector<8x16xi1>, vector<8x16xf32>
    %c0_71 = arith.constant 0 : index
    %c0_72 = arith.constant 0 : index
    %174 = vector.load %arg8[%c0_71, %c0_72] : memref<8x16xf32, #tpu.memory_space<vmem>>, vector<8x16xf32>
    tpu.vector_store %arg8[%c0_71, %c0_72], %173 {strides = array<i32>} : memref<8x16xf32, #tpu.memory_space<vmem>>, vector<8x16xf32>,
    %cst_73 = arith.constant 0.000000e+00 : f32
    %175 = vector.shape_cast %166 : vector<8x1xi1> to vector<8x1xi1>
    %176 = vector.broadcast %175 : vector<8x1xi1> to vector<8x16xi1>
    %177 = vector.broadcast %cst_73 : f32 to vector<8x16xf32>
    %178 = arith.select %176, %164, %177 : vector<8x16xi1>, vector<8x16xf32>
    %c0_74 = arith.constant 0 : index
    %179 = arith.index_cast %131 : i32 to index
    %c0_75 = arith.constant 0 : index
    %c0_76 = arith.constant 0 : index
    %180 = vector.load %arg5[%c0_74, %179, %c0_75, %c0_76] : memref<1x8x8x16xf32, #tpu.memory_space<vmem>>, vector<1x1x8x16xf32>
    %181 = vector.shape_cast %180 : vector<1x1x8x16xf32> to vector<8x16xf32>
    %182 = vector.shape_cast %178 : vector<8x16xf32> to vector<1x1x8x16xf32>
    tpu.vector_store %arg5[%c0_74, %179, %c0_75, %c0_76], %182 {strides = array<i32>} : memref<1x8x8x16xf32, #tpu.memory_space<vmem>>, vector<1x1x8x16xf32>,
    %c3_i32 = arith.constant 3 : i32
    %c1_i32_77 = arith.constant 1 : i32
    %183 = arith.muli %c3_i32, %c1_i32_77 : i32
    %c0_i32_78 = arith.constant 0 : i32
    %184 = arith.addi %c0_i32_78, %183 : i32
    %c2_i32_79 = arith.constant 2 : i32
    %185 = arith.muli %c2_i32_79, %184 : i32
    %c7_i32_80 = arith.constant 7 : i32
    %186 = arith.subi %c7_i32_80, %185 : i32
    %187 = arith.muli %arg0, %186 : i32
    %188 = arith.addi %184, %187 : i32
    %189 = arith.addi %11, %188 : i32
    %c0_81 = arith.constant 0 : index
    %c0_82 = arith.constant 0 : index
    %190 = vector.load %arg7[%c0_81, %c0_82] : memref<8x16xf32, #tpu.memory_space<vmem>>, vector<8x16xf32>
    %c0_83 = arith.constant 0 : index
    %c0_84 = arith.constant 0 : index
    %191 = vector.load %arg8[%c0_83, %c0_84] : memref<8x16xf32, #tpu.memory_space<vmem>>, vector<8x16xf32>
    %c0_85 = arith.constant 0 : index
    %192 = arith.index_cast %188 : i32 to index
    %c0_86 = arith.constant 0 : index
    %c0_87 = arith.constant 0 : index
    %193 = vector.load %arg3[%c0_85, %192, %c0_86, %c0_87] : memref<1x8x8x64xf32, #tpu.memory_space<vmem>>, vector<1x1x8x64xf32>
    %194 = vector.shape_cast %193 : vector<1x1x8x64xf32> to vector<8x64xf32>
    %cst_88 = arith.constant dense<0.000000e+00> : vector<8x64xf32>
    %195 = tpu.matmul %190, %5, %cst_88 {dimension_numbers = #tpu.dot_dimension_numbers<[1], [0], [0], [1], [0, 0, 1, 1], [], []>} : vector<8x16xf32>, vector<16x64xf32>, vector<8x64xf32> -> vector<8x64xf32>
    %196 = arith.addf %194, %195 : vector<8x64xf32>
    %197 = vector.extract_strided_slice %196 {offsets = [0, 0], sizes = [8, 16], strides = [1, 1]} : vector<8x64xf32> to vector<8x16xf32>
    %198 = arith.negf %197 : vector<8x16xf32>
    %199 = math.exp %198 : vector<8x16xf32>
    %cst_89 = arith.constant 1.000000e+00 : f32
    %200 = vector.broadcast %cst_89 : f32 to vector<8x16xf32>
    %201 = arith.addf %200, %199 : vector<8x16xf32>
    %202 = arith.divf %200, %201 : vector<8x16xf32>
    %203 = vector.extract_strided_slice %196 {offsets = [0, 16], sizes = [8, 16], strides = [1, 1]} : vector<8x64xf32> to vector<8x16xf32>
    %204 = arith.negf %203 : vector<8x16xf32>
    %205 = math.exp %204 : vector<8x16xf32>
    %cst_90 = arith.constant 1.000000e+00 : f32
    %206 = vector.broadcast %cst_90 : f32 to vector<8x16xf32>
    %207 = arith.addf %206, %205 : vector<8x16xf32>
    %208 = arith.divf %206, %207 : vector<8x16xf32>
    %209 = vector.extract_strided_slice %196 {offsets = [0, 32], sizes = [8, 16], strides = [1, 1]} : vector<8x64xf32> to vector<8x16xf32>
    %210 = math.tanh %209 : vector<8x16xf32>
    %211 = vector.extract_strided_slice %196 {offsets = [0, 48], sizes = [8, 16], strides = [1, 1]} : vector<8x64xf32> to vector<8x16xf32>
    %212 = arith.negf %211 : vector<8x16xf32>
    %213 = math.exp %212 : vector<8x16xf32>
    %cst_91 = arith.constant 1.000000e+00 : f32
    %214 = vector.broadcast %cst_91 : f32 to vector<8x16xf32>
    %215 = arith.addf %214, %213 : vector<8x16xf32>
    %216 = arith.divf %214, %215 : vector<8x16xf32>
    %217 = arith.mulf %208, %191 : vector<8x16xf32>
    %218 = arith.mulf %202, %210 : vector<8x16xf32>
    %219 = arith.addf %217, %218 : vector<8x16xf32>
    %220 = math.tanh %219 : vector<8x16xf32>
    %221 = arith.mulf %216, %220 : vector<8x16xf32>
    %222 = vector.broadcast %189 : i32 to vector<8x1xi32>
    %223 = arith.cmpi sgt, %3, %222 : vector<8x1xi32>
    %224 = vector.shape_cast %223 : vector<8x1xi1> to vector<8x1xi1>
    %225 = vector.broadcast %224 : vector<8x1xi1> to vector<8x16xi1>
    %226 = arith.select %225, %221, %190 : vector<8x16xi1>, vector<8x16xf32>
    %c0_92 = arith.constant 0 : index
    %c0_93 = arith.constant 0 : index
    %227 = vector.load %arg7[%c0_92, %c0_93] : memref<8x16xf32, #tpu.memory_space<vmem>>, vector<8x16xf32>
    tpu.vector_store %arg7[%c0_92, %c0_93], %226 {strides = array<i32>} : memref<8x16xf32, #tpu.memory_space<vmem>>, vector<8x16xf32>,
    %228 = vector.shape_cast %223 : vector<8x1xi1> to vector<8x1xi1>
    %229 = vector.broadcast %228 : vector<8x1xi1> to vector<8x16xi1>
    %230 = arith.select %229, %219, %191 : vector<8x16xi1>, vector<8x16xf32>
    %c0_94 = arith.constant 0 : index
    %c0_95 = arith.constant 0 : index
    %231 = vector.load %arg8[%c0_94, %c0_95] : memref<8x16xf32, #tpu.memory_space<vmem>>, vector<8x16xf32>
    tpu.vector_store %arg8[%c0_94, %c0_95], %230 {strides = array<i32>} : memref<8x16xf32, #tpu.memory_space<vmem>>, vector<8x16xf32>,
    %cst_96 = arith.constant 0.000000e+00 : f32
    %232 = vector.shape_cast %223 : vector<8x1xi1> to vector<8x1xi1>
    %233 = vector.broadcast %232 : vector<8x1xi1> to vector<8x16xi1>
    %234 = vector.broadcast %cst_96 : f32 to vector<8x16xf32>
    %235 = arith.select %233, %221, %234 : vector<8x16xi1>, vector<8x16xf32>
    %c0_97 = arith.constant 0 : index
    %236 = arith.index_cast %188 : i32 to index
    %c0_98 = arith.constant 0 : index
    %c0_99 = arith.constant 0 : index
    %237 = vector.load %arg5[%c0_97, %236, %c0_98, %c0_99] : memref<1x8x8x16xf32, #tpu.memory_space<vmem>>, vector<1x1x8x16xf32>
    %238 = vector.shape_cast %237 : vector<1x1x8x16xf32> to vector<8x16xf32>
    %239 = vector.shape_cast %235 : vector<8x16xf32> to vector<1x1x8x16xf32>
    tpu.vector_store %arg5[%c0_97, %236, %c0_98, %c0_99], %239 {strides = array<i32>} : memref<1x8x8x16xf32, #tpu.memory_space<vmem>>, vector<1x1x8x16xf32>,
    %c4_i32 = arith.constant 4 : i32
    %c1_i32_100 = arith.constant 1 : i32
    %240 = arith.muli %c4_i32, %c1_i32_100 : i32
    %c0_i32_101 = arith.constant 0 : i32
    %241 = arith.addi %c0_i32_101, %240 : i32
    %c2_i32_102 = arith.constant 2 : i32
    %242 = arith.muli %c2_i32_102, %241 : i32
    %c7_i32_103 = arith.constant 7 : i32
    %243 = arith.subi %c7_i32_103, %242 : i32
    %244 = arith.muli %arg0, %243 : i32
    %245 = arith.addi %241, %244 : i32
    %246 = arith.addi %11, %245 : i32
    %c0_104 = arith.constant 0 : index
    %c0_105 = arith.constant 0 : index
    %247 = vector.load %arg7[%c0_104, %c0_105] : memref<8x16xf32, #tpu.memory_space<vmem>>, vector<8x16xf32>
    %c0_106 = arith.constant 0 : index
    %c0_107 = arith.constant 0 : index
    %248 = vector.load %arg8[%c0_106, %c0_107] : memref<8x16xf32, #tpu.memory_space<vmem>>, vector<8x16xf32>
    %c0_108 = arith.constant 0 : index
    %249 = arith.index_cast %245 : i32 to index
    %c0_109 = arith.constant 0 : index
    %c0_110 = arith.constant 0 : index
    %250 = vector.load %arg3[%c0_108, %249, %c0_109, %c0_110] : memref<1x8x8x64xf32, #tpu.memory_space<vmem>>, vector<1x1x8x64xf32>
    %251 = vector.shape_cast %250 : vector<1x1x8x64xf32> to vector<8x64xf32>
    %cst_111 = arith.constant dense<0.000000e+00> : vector<8x64xf32>
    %252 = tpu.matmul %247, %5, %cst_111 {dimension_numbers = #tpu.dot_dimension_numbers<[1], [0], [0], [1], [0, 0, 1, 1], [], []>} : vector<8x16xf32>, vector<16x64xf32>, vector<8x64xf32> -> vector<8x64xf32>
    %253 = arith.addf %251, %252 : vector<8x64xf32>
    %254 = vector.extract_strided_slice %253 {offsets = [0, 0], sizes = [8, 16], strides = [1, 1]} : vector<8x64xf32> to vector<8x16xf32>
    %255 = arith.negf %254 : vector<8x16xf32>
    %256 = math.exp %255 : vector<8x16xf32>
    %cst_112 = arith.constant 1.000000e+00 : f32
    %257 = vector.broadcast %cst_112 : f32 to vector<8x16xf32>
    %258 = arith.addf %257, %256 : vector<8x16xf32>
    %259 = arith.divf %257, %258 : vector<8x16xf32>
    %260 = vector.extract_strided_slice %253 {offsets = [0, 16], sizes = [8, 16], strides = [1, 1]} : vector<8x64xf32> to vector<8x16xf32>
    %261 = arith.negf %260 : vector<8x16xf32>
    %262 = math.exp %261 : vector<8x16xf32>
    %cst_113 = arith.constant 1.000000e+00 : f32
    %263 = vector.broadcast %cst_113 : f32 to vector<8x16xf32>
    %264 = arith.addf %263, %262 : vector<8x16xf32>
    %265 = arith.divf %263, %264 : vector<8x16xf32>
    %266 = vector.extract_strided_slice %253 {offsets = [0, 32], sizes = [8, 16], strides = [1, 1]} : vector<8x64xf32> to vector<8x16xf32>
    %267 = math.tanh %266 : vector<8x16xf32>
    %268 = vector.extract_strided_slice %253 {offsets = [0, 48], sizes = [8, 16], strides = [1, 1]} : vector<8x64xf32> to vector<8x16xf32>
    %269 = arith.negf %268 : vector<8x16xf32>
    %270 = math.exp %269 : vector<8x16xf32>
    %cst_114 = arith.constant 1.000000e+00 : f32
    %271 = vector.broadcast %cst_114 : f32 to vector<8x16xf32>
    %272 = arith.addf %271, %270 : vector<8x16xf32>
    %273 = arith.divf %271, %272 : vector<8x16xf32>
    %274 = arith.mulf %265, %248 : vector<8x16xf32>
    %275 = arith.mulf %259, %267 : vector<8x16xf32>
    %276 = arith.addf %274, %275 : vector<8x16xf32>
    %277 = math.tanh %276 : vector<8x16xf32>
    %278 = arith.mulf %273, %277 : vector<8x16xf32>
    %279 = vector.broadcast %246 : i32 to vector<8x1xi32>
    %280 = arith.cmpi sgt, %3, %279 : vector<8x1xi32>
    %281 = vector.shape_cast %280 : vector<8x1xi1> to vector<8x1xi1>
    %282 = vector.broadcast %281 : vector<8x1xi1> to vector<8x16xi1>
    %283 = arith.select %282, %278, %247 : vector<8x16xi1>, vector<8x16xf32>
    %c0_115 = arith.constant 0 : index
    %c0_116 = arith.constant 0 : index
    %284 = vector.load %arg7[%c0_115, %c0_116] : memref<8x16xf32, #tpu.memory_space<vmem>>, vector<8x16xf32>
    tpu.vector_store %arg7[%c0_115, %c0_116], %283 {strides = array<i32>} : memref<8x16xf32, #tpu.memory_space<vmem>>, vector<8x16xf32>,
    %285 = vector.shape_cast %280 : vector<8x1xi1> to vector<8x1xi1>
    %286 = vector.broadcast %285 : vector<8x1xi1> to vector<8x16xi1>
    %287 = arith.select %286, %276, %248 : vector<8x16xi1>, vector<8x16xf32>
    %c0_117 = arith.constant 0 : index
    %c0_118 = arith.constant 0 : index
    %288 = vector.load %arg8[%c0_117, %c0_118] : memref<8x16xf32, #tpu.memory_space<vmem>>, vector<8x16xf32>
    tpu.vector_store %arg8[%c0_117, %c0_118], %287 {strides = array<i32>} : memref<8x16xf32, #tpu.memory_space<vmem>>, vector<8x16xf32>,
    %cst_119 = arith.constant 0.000000e+00 : f32
    %289 = vector.shape_cast %280 : vector<8x1xi1> to vector<8x1xi1>
    %290 = vector.broadcast %289 : vector<8x1xi1> to vector<8x16xi1>
    %291 = vector.broadcast %cst_119 : f32 to vector<8x16xf32>
    %292 = arith.select %290, %278, %291 : vector<8x16xi1>, vector<8x16xf32>
    %c0_120 = arith.constant 0 : index
    %293 = arith.index_cast %245 : i32 to index
    %c0_121 = arith.constant 0 : index
    %c0_122 = arith.constant 0 : index
    %294 = vector.load %arg5[%c0_120, %293, %c0_121, %c0_122] : memref<1x8x8x16xf32, #tpu.memory_space<vmem>>, vector<1x1x8x16xf32>
    %295 = vector.shape_cast %294 : vector<1x1x8x16xf32> to vector<8x16xf32>
    %296 = vector.shape_cast %292 : vector<8x16xf32> to vector<1x1x8x16xf32>
    tpu.vector_store %arg5[%c0_120, %293, %c0_121, %c0_122], %296 {strides = array<i32>} : memref<1x8x8x16xf32, #tpu.memory_space<vmem>>, vector<1x1x8x16xf32>,
    %c5_i32 = arith.constant 5 : i32
    %c1_i32_123 = arith.constant 1 : i32
    %297 = arith.muli %c5_i32, %c1_i32_123 : i32
    %c0_i32_124 = arith.constant 0 : i32
    %298 = arith.addi %c0_i32_124, %297 : i32
    %c2_i32_125 = arith.constant 2 : i32
    %299 = arith.muli %c2_i32_125, %298 : i32
    %c7_i32_126 = arith.constant 7 : i32
    %300 = arith.subi %c7_i32_126, %299 : i32
    %301 = arith.muli %arg0, %300 : i32
    %302 = arith.addi %298, %301 : i32
    %303 = arith.addi %11, %302 : i32
    %c0_127 = arith.constant 0 : index
    %c0_128 = arith.constant 0 : index
    %304 = vector.load %arg7[%c0_127, %c0_128] : memref<8x16xf32, #tpu.memory_space<vmem>>, vector<8x16xf32>
    %c0_129 = arith.constant 0 : index
    %c0_130 = arith.constant 0 : index
    %305 = vector.load %arg8[%c0_129, %c0_130] : memref<8x16xf32, #tpu.memory_space<vmem>>, vector<8x16xf32>
    %c0_131 = arith.constant 0 : index
    %306 = arith.index_cast %302 : i32 to index
    %c0_132 = arith.constant 0 : index
    %c0_133 = arith.constant 0 : index
    %307 = vector.load %arg3[%c0_131, %306, %c0_132, %c0_133] : memref<1x8x8x64xf32, #tpu.memory_space<vmem>>, vector<1x1x8x64xf32>
    %308 = vector.shape_cast %307 : vector<1x1x8x64xf32> to vector<8x64xf32>
    %cst_134 = arith.constant dense<0.000000e+00> : vector<8x64xf32>
    %309 = tpu.matmul %304, %5, %cst_134 {dimension_numbers = #tpu.dot_dimension_numbers<[1], [0], [0], [1], [0, 0, 1, 1], [], []>} : vector<8x16xf32>, vector<16x64xf32>, vector<8x64xf32> -> vector<8x64xf32>
    %310 = arith.addf %308, %309 : vector<8x64xf32>
    %311 = vector.extract_strided_slice %310 {offsets = [0, 0], sizes = [8, 16], strides = [1, 1]} : vector<8x64xf32> to vector<8x16xf32>
    %312 = arith.negf %311 : vector<8x16xf32>
    %313 = math.exp %312 : vector<8x16xf32>
    %cst_135 = arith.constant 1.000000e+00 : f32
    %314 = vector.broadcast %cst_135 : f32 to vector<8x16xf32>
    %315 = arith.addf %314, %313 : vector<8x16xf32>
    %316 = arith.divf %314, %315 : vector<8x16xf32>
    %317 = vector.extract_strided_slice %310 {offsets = [0, 16], sizes = [8, 16], strides = [1, 1]} : vector<8x64xf32> to vector<8x16xf32>
    %318 = arith.negf %317 : vector<8x16xf32>
    %319 = math.exp %318 : vector<8x16xf32>
    %cst_136 = arith.constant 1.000000e+00 : f32
    %320 = vector.broadcast %cst_136 : f32 to vector<8x16xf32>
    %321 = arith.addf %320, %319 : vector<8x16xf32>
    %322 = arith.divf %320, %321 : vector<8x16xf32>
    %323 = vector.extract_strided_slice %310 {offsets = [0, 32], sizes = [8, 16], strides = [1, 1]} : vector<8x64xf32> to vector<8x16xf32>
    %324 = math.tanh %323 : vector<8x16xf32>
    %325 = vector.extract_strided_slice %310 {offsets = [0, 48], sizes = [8, 16], strides = [1, 1]} : vector<8x64xf32> to vector<8x16xf32>
    %326 = arith.negf %325 : vector<8x16xf32>
    %327 = math.exp %326 : vector<8x16xf32>
    %cst_137 = arith.constant 1.000000e+00 : f32
    %328 = vector.broadcast %cst_137 : f32 to vector<8x16xf32>
    %329 = arith.addf %328, %327 : vector<8x16xf32>
    %330 = arith.divf %328, %329 : vector<8x16xf32>
    %331 = arith.mulf %322, %305 : vector<8x16xf32>
    %332 = arith.mulf %316, %324 : vector<8x16xf32>
    %333 = arith.addf %331, %332 : vector<8x16xf32>
    %334 = math.tanh %333 : vector<8x16xf32>
    %335 = arith.mulf %330, %334 : vector<8x16xf32>
    %336 = vector.broadcast %303 : i32 to vector<8x1xi32>
    %337 = arith.cmpi sgt, %3, %336 : vector<8x1xi32>
    %338 = vector.shape_cast %337 : vector<8x1xi1> to vector<8x1xi1>
    %339 = vector.broadcast %338 : vector<8x1xi1> to vector<8x16xi1>
    %340 = arith.select %339, %335, %304 : vector<8x16xi1>, vector<8x16xf32>
    %c0_138 = arith.constant 0 : index
    %c0_139 = arith.constant 0 : index
    %341 = vector.load %arg7[%c0_138, %c0_139] : memref<8x16xf32, #tpu.memory_space<vmem>>, vector<8x16xf32>
    tpu.vector_store %arg7[%c0_138, %c0_139], %340 {strides = array<i32>} : memref<8x16xf32, #tpu.memory_space<vmem>>, vector<8x16xf32>,
    %342 = vector.shape_cast %337 : vector<8x1xi1> to vector<8x1xi1>
    %343 = vector.broadcast %342 : vector<8x1xi1> to vector<8x16xi1>
    %344 = arith.select %343, %333, %305 : vector<8x16xi1>, vector<8x16xf32>
    %c0_140 = arith.constant 0 : index
    %c0_141 = arith.constant 0 : index
    %345 = vector.load %arg8[%c0_140, %c0_141] : memref<8x16xf32, #tpu.memory_space<vmem>>, vector<8x16xf32>
    tpu.vector_store %arg8[%c0_140, %c0_141], %344 {strides = array<i32>} : memref<8x16xf32, #tpu.memory_space<vmem>>, vector<8x16xf32>,
    %cst_142 = arith.constant 0.000000e+00 : f32
    %346 = vector.shape_cast %337 : vector<8x1xi1> to vector<8x1xi1>
    %347 = vector.broadcast %346 : vector<8x1xi1> to vector<8x16xi1>
    %348 = vector.broadcast %cst_142 : f32 to vector<8x16xf32>
    %349 = arith.select %347, %335, %348 : vector<8x16xi1>, vector<8x16xf32>
    %c0_143 = arith.constant 0 : index
    %350 = arith.index_cast %302 : i32 to index
    %c0_144 = arith.constant 0 : index
    %c0_145 = arith.constant 0 : index
    %351 = vector.load %arg5[%c0_143, %350, %c0_144, %c0_145] : memref<1x8x8x16xf32, #tpu.memory_space<vmem>>, vector<1x1x8x16xf32>
    %352 = vector.shape_cast %351 : vector<1x1x8x16xf32> to vector<8x16xf32>
    %353 = vector.shape_cast %349 : vector<8x16xf32> to vector<1x1x8x16xf32>
    tpu.vector_store %arg5[%c0_143, %350, %c0_144, %c0_145], %353 {strides = array<i32>} : memref<1x8x8x16xf32, #tpu.memory_space<vmem>>, vector<1x1x8x16xf32>,
    %c6_i32 = arith.constant 6 : i32
    %c1_i32_146 = arith.constant 1 : i32
    %354 = arith.muli %c6_i32, %c1_i32_146 : i32
    %c0_i32_147 = arith.constant 0 : i32
    %355 = arith.addi %c0_i32_147, %354 : i32
    %c2_i32_148 = arith.constant 2 : i32
    %356 = arith.muli %c2_i32_148, %355 : i32
    %c7_i32_149 = arith.constant 7 : i32
    %357 = arith.subi %c7_i32_149, %356 : i32
    %358 = arith.muli %arg0, %357 : i32
    %359 = arith.addi %355, %358 : i32
    %360 = arith.addi %11, %359 : i32
    %c0_150 = arith.constant 0 : index
    %c0_151 = arith.constant 0 : index
    %361 = vector.load %arg7[%c0_150, %c0_151] : memref<8x16xf32, #tpu.memory_space<vmem>>, vector<8x16xf32>
    %c0_152 = arith.constant 0 : index
    %c0_153 = arith.constant 0 : index
    %362 = vector.load %arg8[%c0_152, %c0_153] : memref<8x16xf32, #tpu.memory_space<vmem>>, vector<8x16xf32>
    %c0_154 = arith.constant 0 : index
    %363 = arith.index_cast %359 : i32 to index
    %c0_155 = arith.constant 0 : index
    %c0_156 = arith.constant 0 : index
    %364 = vector.load %arg3[%c0_154, %363, %c0_155, %c0_156] : memref<1x8x8x64xf32, #tpu.memory_space<vmem>>, vector<1x1x8x64xf32>
    %365 = vector.shape_cast %364 : vector<1x1x8x64xf32> to vector<8x64xf32>
    %cst_157 = arith.constant dense<0.000000e+00> : vector<8x64xf32>
    %366 = tpu.matmul %361, %5, %cst_157 {dimension_numbers = #tpu.dot_dimension_numbers<[1], [0], [0], [1], [0, 0, 1, 1], [], []>} : vector<8x16xf32>, vector<16x64xf32>, vector<8x64xf32> -> vector<8x64xf32>
    %367 = arith.addf %365, %366 : vector<8x64xf32>
    %368 = vector.extract_strided_slice %367 {offsets = [0, 0], sizes = [8, 16], strides = [1, 1]} : vector<8x64xf32> to vector<8x16xf32>
    %369 = arith.negf %368 : vector<8x16xf32>
    %370 = math.exp %369 : vector<8x16xf32>
    %cst_158 = arith.constant 1.000000e+00 : f32
    %371 = vector.broadcast %cst_158 : f32 to vector<8x16xf32>
    %372 = arith.addf %371, %370 : vector<8x16xf32>
    %373 = arith.divf %371, %372 : vector<8x16xf32>
    %374 = vector.extract_strided_slice %367 {offsets = [0, 16], sizes = [8, 16], strides = [1, 1]} : vector<8x64xf32> to vector<8x16xf32>
    %375 = arith.negf %374 : vector<8x16xf32>
    %376 = math.exp %375 : vector<8x16xf32>
    %cst_159 = arith.constant 1.000000e+00 : f32
    %377 = vector.broadcast %cst_159 : f32 to vector<8x16xf32>
    %378 = arith.addf %377, %376 : vector<8x16xf32>
    %379 = arith.divf %377, %378 : vector<8x16xf32>
    %380 = vector.extract_strided_slice %367 {offsets = [0, 32], sizes = [8, 16], strides = [1, 1]} : vector<8x64xf32> to vector<8x16xf32>
    %381 = math.tanh %380 : vector<8x16xf32>
    %382 = vector.extract_strided_slice %367 {offsets = [0, 48], sizes = [8, 16], strides = [1, 1]} : vector<8x64xf32> to vector<8x16xf32>
    %383 = arith.negf %382 : vector<8x16xf32>
    %384 = math.exp %383 : vector<8x16xf32>
    %cst_160 = arith.constant 1.000000e+00 : f32
    %385 = vector.broadcast %cst_160 : f32 to vector<8x16xf32>
    %386 = arith.addf %385, %384 : vector<8x16xf32>
    %387 = arith.divf %385, %386 : vector<8x16xf32>
    %388 = arith.mulf %379, %362 : vector<8x16xf32>
    %389 = arith.mulf %373, %381 : vector<8x16xf32>
    %390 = arith.addf %388, %389 : vector<8x16xf32>
    %391 = math.tanh %390 : vector<8x16xf32>
    %392 = arith.mulf %387, %391 : vector<8x16xf32>
    %393 = vector.broadcast %360 : i32 to vector<8x1xi32>
    %394 = arith.cmpi sgt, %3, %393 : vector<8x1xi32>
    %395 = vector.shape_cast %394 : vector<8x1xi1> to vector<8x1xi1>
    %396 = vector.broadcast %395 : vector<8x1xi1> to vector<8x16xi1>
    %397 = arith.select %396, %392, %361 : vector<8x16xi1>, vector<8x16xf32>
    %c0_161 = arith.constant 0 : index
    %c0_162 = arith.constant 0 : index
    %398 = vector.load %arg7[%c0_161, %c0_162] : memref<8x16xf32, #tpu.memory_space<vmem>>, vector<8x16xf32>
    tpu.vector_store %arg7[%c0_161, %c0_162], %397 {strides = array<i32>} : memref<8x16xf32, #tpu.memory_space<vmem>>, vector<8x16xf32>,
    %399 = vector.shape_cast %394 : vector<8x1xi1> to vector<8x1xi1>
    %400 = vector.broadcast %399 : vector<8x1xi1> to vector<8x16xi1>
    %401 = arith.select %400, %390, %362 : vector<8x16xi1>, vector<8x16xf32>
    %c0_163 = arith.constant 0 : index
    %c0_164 = arith.constant 0 : index
    %402 = vector.load %arg8[%c0_163, %c0_164] : memref<8x16xf32, #tpu.memory_space<vmem>>, vector<8x16xf32>
    tpu.vector_store %arg8[%c0_163, %c0_164], %401 {strides = array<i32>} : memref<8x16xf32, #tpu.memory_space<vmem>>, vector<8x16xf32>,
    %cst_165 = arith.constant 0.000000e+00 : f32
    %403 = vector.shape_cast %394 : vector<8x1xi1> to vector<8x1xi1>
    %404 = vector.broadcast %403 : vector<8x1xi1> to vector<8x16xi1>
    %405 = vector.broadcast %cst_165 : f32 to vector<8x16xf32>
    %406 = arith.select %404, %392, %405 : vector<8x16xi1>, vector<8x16xf32>
    %c0_166 = arith.constant 0 : index
    %407 = arith.index_cast %359 : i32 to index
    %c0_167 = arith.constant 0 : index
    %c0_168 = arith.constant 0 : index
    %408 = vector.load %arg5[%c0_166, %407, %c0_167, %c0_168] : memref<1x8x8x16xf32, #tpu.memory_space<vmem>>, vector<1x1x8x16xf32>
    %409 = vector.shape_cast %408 : vector<1x1x8x16xf32> to vector<8x16xf32>
    %410 = vector.shape_cast %406 : vector<8x16xf32> to vector<1x1x8x16xf32>
    tpu.vector_store %arg5[%c0_166, %407, %c0_167, %c0_168], %410 {strides = array<i32>} : memref<1x8x8x16xf32, #tpu.memory_space<vmem>>, vector<1x1x8x16xf32>,
    %c7_i32_169 = arith.constant 7 : i32
    %c1_i32_170 = arith.constant 1 : i32
    %411 = arith.muli %c7_i32_169, %c1_i32_170 : i32
    %c0_i32_171 = arith.constant 0 : i32
    %412 = arith.addi %c0_i32_171, %411 : i32
    %c2_i32_172 = arith.constant 2 : i32
    %413 = arith.muli %c2_i32_172, %412 : i32
    %c7_i32_173 = arith.constant 7 : i32
    %414 = arith.subi %c7_i32_173, %413 : i32
    %415 = arith.muli %arg0, %414 : i32
    %416 = arith.addi %412, %415 : i32
    %417 = arith.addi %11, %416 : i32
    %c0_174 = arith.constant 0 : index
    %c0_175 = arith.constant 0 : index
    %418 = vector.load %arg7[%c0_174, %c0_175] : memref<8x16xf32, #tpu.memory_space<vmem>>, vector<8x16xf32>
    %c0_176 = arith.constant 0 : index
    %c0_177 = arith.constant 0 : index
    %419 = vector.load %arg8[%c0_176, %c0_177] : memref<8x16xf32, #tpu.memory_space<vmem>>, vector<8x16xf32>
    %c0_178 = arith.constant 0 : index
    %420 = arith.index_cast %416 : i32 to index
    %c0_179 = arith.constant 0 : index
    %c0_180 = arith.constant 0 : index
    %421 = vector.load %arg3[%c0_178, %420, %c0_179, %c0_180] : memref<1x8x8x64xf32, #tpu.memory_space<vmem>>, vector<1x1x8x64xf32>
    %422 = vector.shape_cast %421 : vector<1x1x8x64xf32> to vector<8x64xf32>
    %cst_181 = arith.constant dense<0.000000e+00> : vector<8x64xf32>
    %423 = tpu.matmul %418, %5, %cst_181 {dimension_numbers = #tpu.dot_dimension_numbers<[1], [0], [0], [1], [0, 0, 1, 1], [], []>} : vector<8x16xf32>, vector<16x64xf32>, vector<8x64xf32> -> vector<8x64xf32>
    %424 = arith.addf %422, %423 : vector<8x64xf32>
    %425 = vector.extract_strided_slice %424 {offsets = [0, 0], sizes = [8, 16], strides = [1, 1]} : vector<8x64xf32> to vector<8x16xf32>
    %426 = arith.negf %425 : vector<8x16xf32>
    %427 = math.exp %426 : vector<8x16xf32>
    %cst_182 = arith.constant 1.000000e+00 : f32
    %428 = vector.broadcast %cst_182 : f32 to vector<8x16xf32>
    %429 = arith.addf %428, %427 : vector<8x16xf32>
    %430 = arith.divf %428, %429 : vector<8x16xf32>
    %431 = vector.extract_strided_slice %424 {offsets = [0, 16], sizes = [8, 16], strides = [1, 1]} : vector<8x64xf32> to vector<8x16xf32>
    %432 = arith.negf %431 : vector<8x16xf32>
    %433 = math.exp %432 : vector<8x16xf32>
    %cst_183 = arith.constant 1.000000e+00 : f32
    %434 = vector.broadcast %cst_183 : f32 to vector<8x16xf32>
    %435 = arith.addf %434, %433 : vector<8x16xf32>
    %436 = arith.divf %434, %435 : vector<8x16xf32>
    %437 = vector.extract_strided_slice %424 {offsets = [0, 32], sizes = [8, 16], strides = [1, 1]} : vector<8x64xf32> to vector<8x16xf32>
    %438 = math.tanh %437 : vector<8x16xf32>
    %439 = vector.extract_strided_slice %424 {offsets = [0, 48], sizes = [8, 16], strides = [1, 1]} : vector<8x64xf32> to vector<8x16xf32>
    %440 = arith.negf %439 : vector<8x16xf32>
    %441 = math.exp %440 : vector<8x16xf32>
    %cst_184 = arith.constant 1.000000e+00 : f32
    %442 = vector.broadcast %cst_184 : f32 to vector<8x16xf32>
    %443 = arith.addf %442, %441 : vector<8x16xf32>
    %444 = arith.divf %442, %443 : vector<8x16xf32>
    %445 = arith.mulf %436, %419 : vector<8x16xf32>
    %446 = arith.mulf %430, %438 : vector<8x16xf32>
    %447 = arith.addf %445, %446 : vector<8x16xf32>
    %448 = math.tanh %447 : vector<8x16xf32>
    %449 = arith.mulf %444, %448 : vector<8x16xf32>
    %450 = vector.broadcast %417 : i32 to vector<8x1xi32>
    %451 = arith.cmpi sgt, %3, %450 : vector<8x1xi32>
    %452 = vector.shape_cast %451 : vector<8x1xi1> to vector<8x1xi1>
    %453 = vector.broadcast %452 : vector<8x1xi1> to vector<8x16xi1>
    %454 = arith.select %453, %449, %418 : vector<8x16xi1>, vector<8x16xf32>
    %c0_185 = arith.constant 0 : index
    %c0_186 = arith.constant 0 : index
    %455 = vector.load %arg7[%c0_185, %c0_186] : memref<8x16xf32, #tpu.memory_space<vmem>>, vector<8x16xf32>
    tpu.vector_store %arg7[%c0_185, %c0_186], %454 {strides = array<i32>} : memref<8x16xf32, #tpu.memory_space<vmem>>, vector<8x16xf32>,
    %456 = vector.shape_cast %451 : vector<8x1xi1> to vector<8x1xi1>
    %457 = vector.broadcast %456 : vector<8x1xi1> to vector<8x16xi1>
    %458 = arith.select %457, %447, %419 : vector<8x16xi1>, vector<8x16xf32>
    %c0_187 = arith.constant 0 : index
    %c0_188 = arith.constant 0 : index
    %459 = vector.load %arg8[%c0_187, %c0_188] : memref<8x16xf32, #tpu.memory_space<vmem>>, vector<8x16xf32>
    tpu.vector_store %arg8[%c0_187, %c0_188], %458 {strides = array<i32>} : memref<8x16xf32, #tpu.memory_space<vmem>>, vector<8x16xf32>,
    %cst_189 = arith.constant 0.000000e+00 : f32
    %460 = vector.shape_cast %451 : vector<8x1xi1> to vector<8x1xi1>
    %461 = vector.broadcast %460 : vector<8x1xi1> to vector<8x16xi1>
    %462 = vector.broadcast %cst_189 : f32 to vector<8x16xf32>
    %463 = arith.select %461, %449, %462 : vector<8x16xi1>, vector<8x16xf32>
    %c0_190 = arith.constant 0 : index
    %464 = arith.index_cast %416 : i32 to index
    %c0_191 = arith.constant 0 : index
    %c0_192 = arith.constant 0 : index
    %465 = vector.load %arg5[%c0_190, %464, %c0_191, %c0_192] : memref<1x8x8x16xf32, #tpu.memory_space<vmem>>, vector<1x1x8x16xf32>
    %466 = vector.shape_cast %465 : vector<1x1x8x16xf32> to vector<8x16xf32>
    %467 = vector.shape_cast %463 : vector<8x16xf32> to vector<1x1x8x16xf32>
    tpu.vector_store %arg5[%c0_190, %464, %c0_191, %c0_192], %467 {strides = array<i32>} : memref<1x8x8x16xf32, #tpu.memory_space<vmem>>, vector<1x1x8x16xf32>,
    %c8_i32_193 = arith.constant 8 : i32
    %c0_i32_194 = arith.constant 0 : i32
    %468 = arith.cmpi eq, %arg1, %c0_i32_194 : i32
    %469 = arith.extui %468 : i1 to i32
    %c0_i32_195 = arith.constant 0 : i32
    %470 = arith.cmpi ne, %469, %c0_i32_195 : i32
    scf.if %470 {
      %c0_196 = arith.constant 0 : index
      %c0_197 = arith.constant 0 : index
      %471 = vector.load %arg7[%c0_196, %c0_197] : memref<8x16xf32, #tpu.memory_space<vmem>>, vector<8x16xf32>
      %c0_198 = arith.constant 0 : index
      %c0_199 = arith.constant 0 : index
      %c0_200 = arith.constant 0 : index
      %472 = vector.load %arg6[%c0_198, %c0_199, %c0_200] : memref<1x8x16xf32, #tpu.memory_space<vmem>>, vector<1x8x16xf32>
      %473 = vector.shape_cast %472 : vector<1x8x16xf32> to vector<8x16xf32>
      %474 = vector.shape_cast %471 : vector<8x16xf32> to vector<1x8x16xf32>
      tpu.vector_store %arg6[%c0_198, %c0_199, %c0_200], %474 {strides = array<i32>} : memref<1x8x16xf32, #tpu.memory_space<vmem>>, vector<1x8x16xf32>,
    } else {
    }
    return
  }
  func.func @transform_0(%arg0: i32, %arg1: i32) -> (i32, i32) {
    %c0_i32 = arith.constant 0 : i32
    %c0_i32_0 = arith.constant 0 : i32
    %c0_i32_1 = arith.constant 0 : i32
    return %c0_i32, %c0_i32_0 : i32, i32
  }
  func.func @transform_1(%arg0: i32, %arg1: i32) -> (i32, i32, i32, i32) {
    %c2_i32 = arith.constant 2 : i32
    %0 = arith.muli %c2_i32, %arg1 : i32
    %c0_i32 = arith.constant 0 : i32
    %1 = arith.subi %c0_i32, %0 : i32
    %2 = arith.muli %arg0, %1 : i32
    %3 = arith.addi %arg1, %2 : i32
    %c0_i32_0 = arith.constant 0 : i32
    %c0_i32_1 = arith.constant 0 : i32
    %c0_i32_2 = arith.constant 0 : i32
    return %arg0, %3, %c0_i32_0, %c0_i32_1 : i32, i32, i32, i32
  }
  func.func @transform_2(%arg0: i32, %arg1: i32) -> (i32, i32, i32) {
    %c0_i32 = arith.constant 0 : i32
    %c0_i32_0 = arith.constant 0 : i32
    %c0_i32_1 = arith.constant 0 : i32
    return %arg0, %c0_i32, %c0_i32_0 : i32, i32, i32
  }
  func.func @transform_3(%arg0: i32, %arg1: i32) -> (i32, i32, i32, i32) {
    %c2_i32 = arith.constant 2 : i32
    %0 = arith.muli %c2_i32, %arg1 : i32
    %c0_i32 = arith.constant 0 : i32
    %1 = arith.subi %c0_i32, %0 : i32
    %2 = arith.muli %arg0, %1 : i32
    %3 = arith.addi %arg1, %2 : i32
    %c0_i32_0 = arith.constant 0 : i32
    %c0_i32_1 = arith.constant 0 : i32
    %c0_i32_2 = arith.constant 0 : i32
    return %arg0, %3, %c0_i32_0, %c0_i32_1 : i32, i32, i32, i32
  }
  func.func @transform_4(%arg0: i32, %arg1: i32) -> (i32, i32, i32) {
    %c0_i32 = arith.constant 0 : i32
    %c0_i32_0 = arith.constant 0 : i32
    %c0_i32_1 = arith.constant 0 : i32
    return %arg0, %c0_i32, %c0_i32_0 : i32, i32, i32
  }
}

</mosaic_0001>

<bundles_post_ra>
// kernel: tpu_custom_call.1
= control target key start
LH: loop header
LB: loop body
LE: loop exit
PB: predicated region body
PF: predicated region fallthrough
CT: control target
= control target key end

     0   :  { %10 = vsyncpa [#allocation5], 0  ;;  %s2804_s0 = inlined_call_operand.vmem [shape: s32[8,1], index: 0, kind: input, shape index: {}]   ;;  %s2805_s1 = inlined_call_operand.hbm [shape: f32[2,8,8,64], index: 1, kind: input, shape index: {}]   ;;  %s2806_s2 = inlined_call_operand.hbm [shape: f32[2,16,64], index: 2, kind: input, shape index: {}]   ;;  %s2807_s3 = inlined_call_operand.hbm [shape: f32[2,8,8,16], index: 3, kind: output, shape index: {0}]   ;;  %s2808_s4 = inlined_call_operand.hbm [shape: f32[2,8,16], index: 4, kind: output, shape index: {1}]  }
   0x1   :  { %12 = vsyncpa [#allocation5 + $0x1], 0 }
   0x2   :  { %13 = vsyncpa [#allocation8], 0 }
   0x3   :  { %15 = vsyncpa [#allocation8 + $0x1], 0 }
   0x4   :  { %16 = vsyncpa [#allocation6], 0 }
   0x5   :  { %18 = vsyncpa [#allocation6 + $0x1], 0 }
   0x6   :  { %19 = vsyncpa [#allocation11], 0 }
   0x7   :  { %21 = vsyncpa [#allocation11 + $0x1], 0  ;;  %s2228_s15 = smov 0   ;;  %s2230_s16 = smov 0  }
   0x8   :  { %s2232_s17 = smov 0   ;;  %s2234_s18 = smov 0  }
   0x9   :  { %s2236_s19 = smov 0   ;;  %s2238_s20 = smov 0  }
   0xa LB: > { %s1682_s21 = sadd.s32 4294967295, %s2183_s20   ;;  %s1683_s22 = sadd.s32 4294967294, %s2183_s20   ;;  %s2183_s20 = sphi %s2238_s20, %s27_s20   ;;  %s2179_s19 = sphi %s2236_s19, %s2834_s19   ;;  %s2175_s18 = sphi %s2234_s18, %s2833_s18   ;;  %s2171_s17 = sphi %s2232_s17, %s2832_s17   ;;  %s2167_s16 = sphi %s2230_s16, %s2831_s16   ;;  %s2163_s15 = sphi %s2228_s15, %s2830_s15  }
   0xb   : > { %s39_s23 = sadd.s32 1, %s2179_s19  ;;  %s77_s24 = sadd.s32 1, %s2171_s17 }
   0xc   : > { %p41_p0 = scmp.ge.s32.totalorder %s39_s23, 2  ;;  %p84_p1 = scmp.ne.s32.totalorder %s2171_s17, %s2167_s16 }
   0xd   : > { %p85_p2 = scmp.eq.s32.totalorder %s2183_s20, 0  ;;  %p90_p3 = scmp.ne.s32.totalorder %s2167_s16, %s2163_s15 }
   0xe   : > { %s2836_s23 = smov (%p41_p0, %s39_s23), 0  ;;  %p91_p5 = scmp.eq.s32.totalorder %s1682_s21, 0 }
   0xf   : > { %p2269_p4 = por %p85_p2, %p84_p1  ;;  %s72_s26 = ssub.s32 %s2179_s19, %s2836_s23 }
  0x10   : > { %p150_p6 = scmp.eq.s32.totalorder %s1682_s21, 1  ;;  %p75_p7 = scmp.eq.s32.totalorder %s72_s26, 0 }
  0x11   : > { %p2275_p8 = por %p91_p5, %p90_p3  ;;  %p156_p10 = scmp.eq.s32.totalorder %s1683_s22, 1 }
  0x12   : > { %p2279_p9 = por %p150_p6, %p84_p1  ;;  %p1875_p13 = scmp.lt.s32.totalorder %s2183_s20, 2 }
  0x13   : > { %s2816_s27 = scalar_select %p2275_p8, 1, 0 }
  0x14   : > { %s2817_s28 = scalar_select %p2279_p9, 1, 0 }
  0x15   : > { %s2284_s29 = scalar_select %p75_p7, %s2171_s17, %s77_s24  }
  0x16   : > { %p2286_p11 = por %p156_p10, %p90_p3  ;;  %s2293_s5 = sand.u32 1, %s2171_s17  }
  0x17   : > { %s1686_s6 = sshll.u32 %s2293_s5, 6  ;;  %s1746_s7 = sshll.u32 %s2179_s19, 10 }
  0x18   : > { %s2818_s30 = scalar_select %p2286_p11, 1, 0 }
  0x19   : > { %s2300_s10 = scalar_lea.hbm %s2805_s1, %s1746_s7  ;;  %s209_s11 = scalar_lea.vmem [#allocation4], %s1686_s6 }
  0x1a   : > { %s222_s12 = sshll.u32 %s209_s11, 4  ;;  %p2306_p0 = pnand %p1875_p13, %p2269_p4  ;;  %s2302_s12 = int_to_ptr.vmem [resolvable:$true] %s222_s12 }
  0x1b   : > { %s206_s14 = scalar_lea.sflag [#allocation5], %s2293_s5  ;;  %s2005_s21 = scalar_lea.hbm %s2300_s10, 1024 }
  0x1c   : > { %p2006_p2 = scmp.ne.s32.totalorder %s2300_s10, %s2005_s21  ;;  %p2007_p3 = pneg %p2306_p0 }
  0x1d   : > { %s2010_s25 = scalar_lea.hbm %s2805_s1, 2048  ;;  %p2011_p4 = scmp.lt.u32.totalorder %s2300_s10, %s2805_s1 }
  0x1e   : > { %p2008_p5 = pnand %p2007_p3, %p2006_p2  ;;  %p2012_p7 = scmp.lt.u32.totalorder %s2010_s25, %s2005_s21 }
  0x1f   : > { %p2014_p13 = scmp.lt.u32.totalorder %s2005_s21, %s2300_s10 }
  0x20   : > { %p2009_p6 = pneg %p2008_p5  ;;  %p2013_p10 = por %p2012_p7, %p2011_p4 }
  0x22   : > { %p2015_p12 = por %p2014_p13, %p2013_p10 }
  0x24   : > { %p2016_p1 = pnand %p2015_p12, %p2009_p6 }
  0x26   : > { %2019 = shalt.err (!%p2016_p1)
}
  0x27   : > { %s2020_s7 = scalar_lea.vmem %s2302_s12, 1024  ;;  %s2185_s8 = smov [#allocation4]  }
  0x28   : > { %p2021_p2 = scmp.ne.s32.totalorder %s2302_s12, %s2020_s7  ;;  %s2025_s9 = sshll.u32 %s2185_s8, 4  ;;  %s2026_s9 = int_to_ptr.vmem [resolvable:$false] %s2025_s9 }
  0x29   : > { %s2027_s11 = scalar_lea.vmem %s2026_s9, 2048  ;;  %p2028_p9 = scmp.lt.s32.totalorder %s2302_s12, %s2026_s9 }
  0x2a   : > { %p2023_p5 = pnand %p2021_p2, %p2007_p3  ;;  %p2029_p4 = scmp.lt.s32.totalorder %s2027_s11, %s2020_s7 }
  0x2c   : > { %p2024_p11 = pneg %p2023_p5  ;;  %p2030_p7 = por %p2029_p4, %p2028_p9 }
  0x2e   : > { %p2031_p10 = pnand %p2030_p7, %p2024_p11 }
  0x30   : > { %2034 = shalt.err (!%p2031_p10)
}
  0x31   : > { %s2810_s21 = smov 128   ;;  %s2187_s22 = smov 8  }
  0x32   : > { %1864 = dma.hbm_to_vmem [thread:$0]  (!%p2306_p0), %s2300_s10, 1024, %s2302_s12, %s206_s14, %s2810_s21, %s2810_s21, %s2187_s22  }
  0x33   : > { %p251_p9 = scmp.lt.s32.totalorder %s2183_s20, 3  ;;  %s1689_s24 = sshll.u32 %s2293_s5, 4 }
  0x34   : > { %s1747_s25 = sshll.u32 %s2179_s19, 8  ;;  %p2820_p11 = scmp.ge.s32.totalorder %s2183_s20, 1 }
  0x35   : > { %s2354_s8 = scalar_lea.hbm %s2806_s2, %s1747_s25  ;;  %s236_s9 = scalar_lea.vmem [#allocation7], %s1689_s24 }
  0x36   : > { %p2347_p12 = pnand %p2820_p11, %p251_p9  ;;  %s243_s11 = sshll.u32 %s236_s9, 4  ;;  %s2356_s11 = int_to_ptr.vmem [resolvable:$true] %s243_s11 }
  0x37   : > { %s233_s10 = scalar_lea.sflag [#allocation8], %s2293_s5  ;;  %s2035_s12 = scalar_lea.hbm %s2354_s8, 256 }
  0x38   : > { %p2036_p1 = scmp.ne.s32.totalorder %s2354_s8, %s2035_s12  ;;  %s2040_s25 = scalar_lea.hbm %s2806_s2, 512 }
  0x39   : > { %p2041_p2 = scmp.lt.u32.totalorder %s2354_s8, %s2806_s2  ;;  %p2042_p5 = scmp.lt.u32.totalorder %s2040_s25, %s2035_s12 }
  0x3a   : > { %p2038_p6 = pnand %p2036_p1, %p2007_p3  ;;  %p2044_p7 = scmp.lt.u32.totalorder %s2035_s12, %s2354_s8 }
  0x3b   : > { %p2043_p4 = por %p2042_p5, %p2041_p2 }
  0x3c   : > { %p2039_p13 = pneg %p2038_p6 }
  0x3d   : > { %p2045_p10 = por %p2044_p7, %p2043_p4 }
  0x3f   : > { %p2046_p9 = pnand %p2045_p10, %p2039_p13 }
  0x41   : > { %2049 = shalt.err (!%p2046_p9)
}
  0x42   : > { %s2050_s24 = scalar_lea.vmem %s2356_s11, 256  ;;  %s2188_s21 = smov [#allocation7]  }
  0x43   : > { %p2051_p11 = scmp.ne.s32.totalorder %s2356_s11, %s2050_s24  ;;  %s2055_s9 = sshll.u32 %s2188_s21, 4  ;;  %s2056_s9 = int_to_ptr.vmem [resolvable:$false] %s2055_s9 }
  0x44   : > { %s2057_s14 = scalar_lea.vmem %s2056_s9, 512  ;;  %p2058_p8 = scmp.lt.s32.totalorder %s2356_s11, %s2056_s9 }
  0x45   : > { %p2053_p1 = pnand %p2051_p11, %p2007_p3  ;;  %p2059_p2 = scmp.lt.s32.totalorder %s2057_s14, %s2050_s24 }
  0x47   : > { %p2054_p6 = pneg %p2053_p1  ;;  %p2060_p5 = por %p2059_p2, %p2058_p8 }
  0x49   : > { %p2061_p4 = pnand %p2060_p5, %p2054_p6 }
  0x4b   : > { %2064 = shalt.err (!%p2061_p4)
}
  0x4c   : > { %s2822_s12 = smov 128   ;;  %255 = sbr.rel (%p2347_p12) target bundleno = 5826 (0x16c2), region = 32 }
  0x4d   : > { %1867 = dma.hbm_to_vmem [thread:$0]  (!%p2306_p0), %s2354_s8, 256, %s2356_s11, %s233_s10, %s2822_s12, %s2822_s12, %s2187_s22  }
  0x4e   : > { %s2390_s25 = sand.u32 (!%p2347_p12), 1, %s2167_s16   ;;  %p2823_p8 = scmp.ne.s32.totalorder (!%p2347_p12), %s2816_s27, 0 }
  0x4f   : > { %s1693_s6 = sshll.u32 (!%p2347_p12), %s2390_s25, 6  ;;  %s258_s13 = scalar_lea.sflag (!%p2347_p12), [#allocation5], %s2390_s25 }
  0x50   : > { %s2396_s7 = scalar_lea.vmem (!%p2347_p12), [#allocation4], %s1693_s6 }
  0x53   : > { %2146 = dma.done.wait (%p2823_p8), %s258_s13, 1024  }
  0x54   : > { %2148 = vsyncadd (%p2823_p8), %s258_s13, 4294966272  ;;  %s1694_s5 = sshll.u32 %s2390_s25, 4  ;;  %s267_s22 = scalar_lea.sflag [#allocation8], %s2390_s25 }
  0x55   : > { %s270_s26 = scalar_lea.vmem [#allocation7], %s1694_s5 }
  0x56   : > { %2150 = dma.done.wait (%p2823_p8), %s267_s22, 256  }
  0x57   : > { %2152 = vsyncadd (%p2823_p8), %s267_s22, 4294967040  ;;  %vm319_vm0 = vcmask 130048   ;;  %v2189_v0 = vmov 0.0|0.0   ;;  %vm2190_vm1 = vmmov 0   ;;  %v2191_v1 = vmov 0.0   ;;  %v323_v2 = vld [vmem:[%s270_s26] sm:$0xff] }
  0x58   : > { %1829 = vmatprep.subr.bf16.mxu0 %v2189_v0  ;;  %1777 = vmatprep.mubr.msk.f32.mxu0 %vm2190_vm1, %v2191_v1  ;;  %320 = vst.msk [vmem:[#allocation2] sm:$0xff] %vm319_vm0, %v2191_v1  ;;  %321 = vst.msk [vmem:[#allocation3] sm:$0xff] %vm319_vm0, %v2191_v1  ;;  %v324_v3 = vld [vmem:[%s270_s26 + $0x8] sm:$0xff]  ;;  %s1697_s27 = smul.u32 56, %s2175_s18  ;;  %v2192_v10 = vmov 0   ;;  %s2193_s11 = smov 96  }
  0x59   : > { %1832 = vmatprep.subr.bf16.mxu1 %v2189_v0  ;;  %1784 = vmatprep.mubr.msk.f32.mxu1 %vm2190_vm1, %v2191_v1  ;;  %v2418_v4 = vpack.c.bf16 %v324_v3, %v323_v2  ;;  %s2194_s10 = smov 16   ;;  %s331_s24 = smul.u32 7, %s2175_s18  ;;  %v2441_v16 = vld [vmem:[%s2804_s0] sm:$0xff] }
  0x5a   : > { %s336_s8 = scalar_lea.vmem %s2396_s7, %s1697_s27 [#allocation4]  ;;  %1939 = vset.pattern.permute.xlu1 %v2192_v10  ;;  %1940 = vset.pattern.permute.xlu0 %v2192_v10  ;;  %s2195_s14 = smov 48  }
  0x5b   : > { %1831 = vmatpush3.bf16.msra.mxu0 %v2418_v4  ;;  %1834 = vmatpush3.bf16.msra.mxu1 %v2418_v4  ;;  %v337_v6 = vld [vmem:[%s336_s8] sm:$0xff]  ;;  %v441_v17 = vstv %s331_s24  ;;  %s2196_s12 = smov 32   ;;  %s2197_s13 = smov 112  }
  0x5c   : > { %1835 = vmatprep.subr.bf16.mxu0 %v2189_v0  ;;  %1838 = vmatprep.subr.bf16.mxu1 %v2189_v0  ;;  %vm442_vm2 = vcmp.gt.s32.totalorder %v2441_v16, %v441_v17  ;;  %s470_s5 = smul.u32 5, %s2175_s18  ;;  %s2198_s22 = smov 80  }
  0x5d   : > { %v443_v21 = vsel %vm442_vm2, 1, %v2192_v10  ;;  %s1700_s8 = smul.u32 40, %s2175_s18  ;;  %p2827_p3 = scmp.ne.s32.totalorder %s2817_s28, 0 }
  0x5e   : > { %s471_s26 = sadd.s32 1, %s470_s5  ;;  %s609_s21 = smul.u32 3, %s2175_s18 }
  0x5f   : > { %v333_v5 = vld [vmem:[#allocation2] sm:$0xff]  ;;  %v334_v12 = vld [vmem:[#allocation3] sm:$0xff]  ;;  %v580_v34 = vstv %s471_s26  ;;  %s1564_s24 = scalar_lea.vmem %s2396_s7, %s1700_s8 [#allocation4]  ;;  %s1706_s5 = smul.u32 24, %s2175_s18 }
  0x60   : > { %1778 = vmatmul.mubr.msk.f32.vlgmr.msra.gmra.mrb[0].mxu0 %vm319_vm0, %v333_v5  ;;  %vm581_vm4 = vcmp.gt.s32.totalorder %v2441_v16, %v580_v34  ;;  %v1701_v39 = vld [vmem:[%s1564_s24 + $0x8] sm:$0xff]  ;;  %s610_s9 = sadd.s32 2, %s609_s21  ;;  %s748_s24 = sadd.s32 3, %s2175_s18 }
  0x61   : > { %1837 = vmatpush3.bf16.msra.mxu0 %v2418_v4  ;;  %1791 = vmatprep.mubr.msk.f32.mxu0 %vm2190_vm1, %v2191_v1  ;;  %v582_v36 = vsel %vm581_vm4, 1, %v2192_v10  ;;  %v719_v59 = vstv %s610_s9  ;;  %s1572_s26 = scalar_lea.vmem %s2396_s7, %s1706_s5 [#allocation4]  ;;  %s2814_s21 = sshll.u32 %s2175_s18, 3 }
  0x62   : > { %1841 = vmatprep.subr.bf16.mxu0 %v2189_v0  ;;  %vm720_vm6 = vcmp.gt.s32.totalorder %v2441_v16, %v719_v59  ;;  %s1579_s9 = scalar_lea.vmem %s2396_s7, %s2814_s21 [#allocation4] }
  0x63   : > { %v721_v62 = vsel %vm720_vm6, 1, %v2192_v10 }
 0x133   : > { %v408_v7 = vpop.f32.mrb[0].mxu0 }
 0x134   : > { %v412_v8 = vadd.f32 %v408_v7, %v337_v6  ;;  %v1779_v9 = vpop.f32.mrb[1].mxu0  ;;  %v1707_v6 = vld [vmem:[%s1572_s26 + $0x10] sm:$0xff]  ;;  %s886_s26 = ssub.s32 4, %s2175_s18 }
 0x136   : > { %1941 = vtanh.f32 %v412_v8  ;;  %v1699_v13 = vmul.f32 -1.442695, %v412_v8 }
 0x138   : > { %1943 = vpow2.f32 %v1699_v13 }
 0x140   : > { %v1942_v11 = vpop.eup %1941 }
 0x141   : > { %426 = vrot.lane.b32.xlu0 %v1942_v11, %s2193_s11 }
 0x142   : > { %v1944_v14 = vpop.eup %1943 }
 0x143   : > { %v416_v15 = vadd.f32 1.0, %v1944_v14 }
 0x145   : > { %421 = vrot.lane.b32.xlu0 %v334_v12, %s2194_s10  ;;  %1945 = vrcp.f32 %v416_v15 }
 0x14f   : > { %v1946_v18 = vpop.eup %1945 }
 0x1b3   : > { %v427_v19 = vpop.permute.xlu0 %426 }
 0x1b4   : > { %v429_v20 = vmul.f32 %v1946_v18, %v427_v19 }
 0x1b6   : > { %431 = vrot.lane.b32.xlu1 %v429_v20, %s2194_s10 }
 0x1b7   : > { %v422_v22 = vpop.permute.xlu0 %421 }
 0x1b8   : > { %v424_v23 = vmul.f32 %v1946_v18, %v422_v22 }
 0x1ba   : > { %445 = vperm.xlu1 %1939, %v443_v21  }
 0x1be   : > { %448 = vrot.lane.b32.xlu1 %v333_v5, %s2195_s14 }
 0x228   : > { %v432_v24 = vpop.permute.xlu1 %431 }
 0x229   : > { %v434_v25 = vadd.f32 %v432_v24, %v424_v23 }
 0x22b   : > { %1947 = vtanh.f32 %v434_v25 }
 0x235   : > { %v1948_v26 = vpop.eup %1947 }
 0x236   : > { %437 = vrot.lane.b32.xlu0 %v1948_v26, %s2196_s12 }
 0x239   : > { %v2448_v27 = vpop.permute.xlu1 %445 }
 0x23a   : > { %vm447_vm3 = vcmp.eq.s32.totalorder %v2448_v27, 1 }
 0x23b   : > { %v457_v28 = vsel %vm447_vm3, %v434_v25, %v422_v22 }
 0x23c   : > { %459 = vrot.lane.b32.xlu1 %v457_v28, %s2197_s13 }
 0x23d   : > { %v449_v30 = vpop.permute.xlu1 %448 }
 0x2a8   : > { %v438_v29 = vpop.permute.xlu0 %437 }
 0x2a9   : > { %v2454_v31 = vmul.f32 %v1946_v18, %v438_v29  ;;  %v857_v29 = vstv %s748_s24  ;;  %s2564_s24 = sshll.u32 %s886_s26, 3 }
 0x2aa   : > { %vm858_vm8 = vcmp.gt.s32.totalorder %v2441_v16, %v857_v29 }
 0x2ab   : > { %v451_v32 = vsel %vm447_vm3, %v2454_v31, %v449_v30 }
 0x2ac   : > { %453 = vrot.lane.b32.xlu0 %v451_v32, %s2198_s22 }
 0x2ae   : > { %v460_v33 = vpop.permute.xlu1 %459 }
 0x2af   : > { %462 = vst.msk [vmem:[#allocation3] sm:$0xff] %vm319_vm0, %v460_v33  ;;  %v859_v33 = vsel %vm858_vm8, 1, %v2192_v10 }
 0x2b6   : > { %v474_v35 = vld [vmem:[#allocation3] sm:$0xff] }
 0x2b7   : > { %560 = vrot.lane.b32.xlu1 %v474_v35, %s2194_s10 }
 0x2bb   : > { %584 = vperm.xlu1 %1939, %v582_v36  }
 0x31e   : > { %v454_v37 = vpop.permute.xlu0 %453 }
 0x31f   : > { %456 = vst.msk [vmem:[#allocation2] sm:$0xff] %vm319_vm0, %v454_v37 }
 0x326   : > { %v473_v38 = vld [vmem:[#allocation2] sm:$0xff] }
 0x327   : > { %587 = vrot.lane.b32.xlu1 %v473_v38, %s2195_s14  ;;  %1785 = vmatmul.mubr.msk.f32.vlgmr.msra.gmra.mrb[0].mxu1 %vm319_vm0, %v473_v38  ;;  %v1713_v38 = vld [vmem:[%s1579_s9 + $0x18] sm:$0xff]  ;;  %s891_s9 = scalar_lea.vmem %s2396_s7, %s2564_s24 [#allocation4] }
 0x328   : > { %1840 = vmatpush3.bf16.msra.mxu1 %v2418_v4  ;;  %1798 = vmatprep.mubr.msk.f32.mxu1 %vm2190_vm1, %v2191_v1 }
 0x329   : > { %1844 = vmatprep.subr.bf16.mxu1 %v2189_v0  ;;  %v561_v50 = vpop.permute.xlu1 %560 }
 0x33a   : > { %v2478_v51 = vpop.permute.xlu1 %584 }
 0x33b   : > { %vm586_vm5 = vcmp.eq.s32.totalorder %v2478_v51, 1 }
 0x399   : > { %v588_v57 = vpop.permute.xlu1 %587 }
 0x3fa   : > { %v547_v40 = vpop.f32.mrb[0].mxu1 }
 0x3fb   : > { %v551_v41 = vadd.f32 %v1701_v39, %v547_v40  ;;  %v1786_v42 = vpop.f32.mrb[1].mxu1 }
 0x3fd   : > { %1949 = vtanh.f32 %v551_v41  ;;  %v1703_v44 = vmul.f32 -1.442695, %v551_v41 }
 0x3ff   : > { %1951 = vpow2.f32 %v1703_v44 }
 0x407   : > { %v1950_v43 = vpop.eup %1949 }
 0x408   : > { %565 = vrot.lane.b32.xlu0 %v1950_v43, %s2193_s11 }
 0x409   : > { %v1952_v45 = vpop.eup %1951 }
 0x40a   : > { %v555_v46 = vadd.f32 1.0, %v1952_v45 }
 0x40c   : > { %1953 = vrcp.f32 %v555_v46 }
 0x416   : > { %v1954_v47 = vpop.eup %1953 }
 0x417   : > { %v563_v52 = vmul.f32 %v1954_v47, %v561_v50 }
 0x47a   : > { %v566_v48 = vpop.permute.xlu0 %565 }
 0x47b   : > { %v568_v49 = vmul.f32 %v1954_v47, %v566_v48 }
 0x47d   : > { %570 = vrot.lane.b32.xlu0 %v568_v49, %s2194_s10 }
 0x4ef   : > { %v571_v53 = vpop.permute.xlu0 %570 }
 0x4f0   : > { %v573_v54 = vadd.f32 %v571_v53, %v563_v52 }
 0x4f2   : > { %1955 = vtanh.f32 %v573_v54  ;;  %v596_v55 = vsel %vm586_vm5, %v573_v54, %v561_v50 }
 0x4f3   : > { %598 = vrot.lane.b32.xlu1 %v596_v55, %s2197_s13 }
 0x4fc   : > { %v1956_v56 = vpop.eup %1955 }
 0x4fd   : > { %576 = vrot.lane.b32.xlu0 %v1956_v56, %s2196_s12 }
 0x565   : > { %v599_v58 = vpop.permute.xlu1 %598 }
 0x566   : > { %601 = vst.msk [vmem:[#allocation3] sm:$0xff] %vm319_vm0, %v599_v58  ;;  %v995_v58 = vstv %s886_s26  ;;  %s1024_s26 = smul.u32 4294967293, %s2175_s18 }
 0x567   : > { %vm996_vm10 = vcmp.gt.s32.totalorder %v2441_v16, %v995_v58 }
 0x56d   : > { %v613_v60 = vld [vmem:[#allocation3] sm:$0xff] }
 0x56e   : > { %699 = vrot.lane.b32.xlu1 %v613_v60, %s2194_s10 }
 0x56f   : > { %v577_v61 = vpop.permute.xlu0 %576 }
 0x570   : > { %v2490_v63 = vmul.f32 %v1954_v47, %v577_v61  ;;  %v997_v61 = vsel %vm996_vm10, 1, %v2192_v10 }
 0x572   : > { %723 = vperm.xlu1 %1939, %v721_v62   ;;  %v590_v2 = vsel %vm586_vm5, %v2490_v63, %v588_v57 }
 0x573   : > { %592 = vrot.lane.b32.xlu0 %v590_v2, %s2198_s22 }
 0x5e0   : > { %v700_v19 = vpop.permute.xlu1 %699 }
 0x5e5   : > { %v593_v3 = vpop.permute.xlu0 %592 }
 0x5e6   : > { %595 = vst.msk [vmem:[#allocation2] sm:$0xff] %vm319_vm0, %v593_v3 }
 0x5ed   : > { %v612_v5 = vld [vmem:[#allocation2] sm:$0xff] }
 0x5ee   : > { %726 = vrot.lane.b32.xlu1 %v612_v5, %s2195_s14  ;;  %1792 = vmatmul.mubr.msk.f32.vlgmr.msra.gmra.mrb[2].mxu0 %vm319_vm0, %v612_v5 }
 0x5ef   : > { %1843 = vmatpush3.bf16.msra.mxu0 %v2418_v4  ;;  %1805 = vmatprep.mubr.msk.f32.mxu0 %vm2190_vm1, %v2191_v1 }
 0x5f0   : > { %1847 = vmatprep.subr.bf16.mxu0 %v2189_v0 }
 0x5f1   : > { %v2509_v20 = vpop.permute.xlu1 %723 }
 0x5f2   : > { %vm725_vm7 = vcmp.eq.s32.totalorder %v2509_v20, 1 }
 0x660   : > { %v727_v26 = vpop.permute.xlu1 %726 }
 0x6c1   : > { %v686_v7 = vpop.f32.mrb[2].mxu0 }
 0x6c2   : > { %v690_v8 = vadd.f32 %v1707_v6, %v686_v7  ;;  %v1793_v9 = vpop.f32.mrb[3].mxu0  ;;  %v892_v6 = vld [vmem:[%s891_s9] sm:$0xff]  ;;  %s1025_s9 = sadd.s32 5, %s1024_s26  ;;  %s2812_s26 = smul.u32 4294967272, %s2175_s18 }
 0x6c4   : > { %1957 = vtanh.f32 %v690_v8  ;;  %v1709_v12 = vmul.f32 -1.442695, %v690_v8 }
 0x6c6   : > { %1959 = vpow2.f32 %v1709_v12 }
 0x6ce   : > { %v1958_v11 = vpop.eup %1957 }
 0x6cf   : > { %704 = vrot.lane.b32.xlu0 %v1958_v11, %s2193_s11 }
 0x6d0   : > { %v1960_v13 = vpop.eup %1959 }
 0x6d1   : > { %v694_v14 = vadd.f32 1.0, %v1960_v13 }
 0x6d3   : > { %1961 = vrcp.f32 %v694_v14 }
 0x6dd   : > { %v1962_v15 = vpop.eup %1961 }
 0x6de   : > { %v702_v21 = vmul.f32 %v1962_v15, %v700_v19 }
 0x741   : > { %v705_v17 = vpop.permute.xlu0 %704 }
 0x742   : > { %v707_v18 = vmul.f32 %v1962_v15, %v705_v17 }
 0x744   : > { %709 = vrot.lane.b32.xlu0 %v707_v18, %s2194_s10 }
 0x7b6   : > { %v710_v22 = vpop.permute.xlu0 %709 }
 0x7b7   : > { %v712_v23 = vadd.f32 %v710_v22, %v702_v21 }
 0x7b9   : > { %1963 = vtanh.f32 %v712_v23  ;;  %v735_v24 = vsel %vm725_vm7, %v712_v23, %v700_v19 }
 0x7ba   : > { %737 = vrot.lane.b32.xlu1 %v735_v24, %s2197_s13 }
 0x7c3   : > { %v1964_v25 = vpop.eup %1963 }
 0x7c4   : > { %715 = vrot.lane.b32.xlu0 %v1964_v25, %s2196_s12 }
 0x82c   : > { %v738_v28 = vpop.permute.xlu1 %737 }
 0x82d   : > { %740 = vst.msk [vmem:[#allocation3] sm:$0xff] %vm319_vm0, %v738_v28 }
 0x834   : > { %v751_v30 = vld [vmem:[#allocation3] sm:$0xff] }
 0x835   : > { %837 = vrot.lane.b32.xlu1 %v751_v30, %s2194_s10  ;;  %v1134_v30 = vstv %s1025_s9  ;;  %s1590_s9 = scalar_lea.vmem %s2396_s7, %s2812_s26 [#allocation4] }
 0x836   : > { %v716_v32 = vpop.permute.xlu0 %715  ;;  %vm1135_vm12 = vcmp.gt.s32.totalorder %v2441_v16, %v1134_v30 }
 0x837   : > { %v2521_v34 = vmul.f32 %v1962_v15, %v716_v32 }
 0x839   : > { %861 = vperm.xlu1 %1939, %v859_v33   ;;  %v729_v35 = vsel %vm725_vm7, %v2521_v34, %v727_v26 }
 0x83a   : > { %731 = vrot.lane.b32.xlu0 %v729_v35, %s2198_s22  ;;  %v1136_v35 = vsel %vm1135_vm12, 1, %v2192_v10 }
 0x8ac   : > { %v732_v36 = vpop.permute.xlu0 %731 }
 0x8ad   : > { %734 = vst.msk [vmem:[#allocation2] sm:$0xff] %vm319_vm0, %v732_v36 }
 0x8b4   : > { %v750_v37 = vld [vmem:[#allocation2] sm:$0xff] }
 0x8b5   : > { %864 = vrot.lane.b32.xlu1 %v750_v37, %s2195_s14  ;;  %1799 = vmatmul.mubr.msk.f32.vlgmr.msra.gmra.mrb[2].mxu1 %vm319_vm0, %v750_v37 }
 0x8b6   : > { %1846 = vmatpush3.bf16.msra.mxu1 %v2418_v4  ;;  %1812 = vmatprep.mubr.msk.f32.mxu1 %vm2190_vm1, %v2191_v1 }
 0x8b7   : > { %1850 = vmatprep.subr.bf16.mxu1 %v2189_v0  ;;  %v838_v0 = vpop.permute.xlu1 %837 }
 0x8bb   : > { %v2540_v49 = vpop.permute.xlu1 %861 }
 0x8bc   : > { %vm863_vm9 = vcmp.eq.s32.totalorder %v2540_v49, 1 }
 0x927   : > { %v865_v56 = vpop.permute.xlu1 %864 }
 0x988   : > { %v824_v39 = vpop.f32.mrb[2].mxu1 }
 0x989   : > { %v828_v40 = vadd.f32 %v1713_v38, %v824_v39  ;;  %v1800_v41 = vpop.f32.mrb[3].mxu1 }
 0x98b   : > { %1965 = vtanh.f32 %v828_v40  ;;  %v1715_v43 = vmul.f32 -1.442695, %v828_v40  ;;  %v1722_v40 = vld [vmem:[%s1590_s9 + $0x28] sm:$0xff]  ;;  %s1163_s9 = smul.u32 4294967291, %s2175_s18 }
 0x98d   : > { %1967 = vpow2.f32 %v1715_v43  ;;  %s1164_s26 = sadd.s32 6, %s1163_s9 }
 0x995   : > { %v1966_v42 = vpop.eup %1965 }
 0x996   : > { %842 = vrot.lane.b32.xlu0 %v1966_v42, %s2193_s11 }
 0x997   : > { %v1968_v44 = vpop.eup %1967 }
 0x998   : > { %v832_v45 = vadd.f32 1.0, %v1968_v44 }
 0x99a   : > { %1969 = vrcp.f32 %v832_v45 }
 0x9a4   : > { %v1970_v46 = vpop.eup %1969 }
 0x9a5   : > { %v840_v50 = vmul.f32 %v1970_v46, %v838_v0 }
 0xa08   : > { %v843_v47 = vpop.permute.xlu0 %842 }
 0xa09   : > { %v845_v48 = vmul.f32 %v1970_v46, %v843_v47 }
 0xa0b   : > { %847 = vrot.lane.b32.xlu0 %v845_v48, %s2194_s10 }
 0xa7d   : > { %v848_v52 = vpop.permute.xlu0 %847 }
 0xa7e   : > { %v850_v53 = vadd.f32 %v848_v52, %v840_v50 }
 0xa80   : > { %1971 = vtanh.f32 %v850_v53  ;;  %v873_v54 = vsel %vm863_vm9, %v850_v53, %v838_v0 }
 0xa81   : > { %875 = vrot.lane.b32.xlu1 %v873_v54, %s2197_s13 }
 0xa8a   : > { %v1972_v55 = vpop.eup %1971 }
 0xa8b   : > { %853 = vrot.lane.b32.xlu0 %v1972_v55, %s2196_s12 }
 0xaf3   : > { %v876_v57 = vpop.permute.xlu1 %875 }
 0xaf4   : > { %878 = vst.msk [vmem:[#allocation3] sm:$0xff] %vm319_vm0, %v876_v57 }
 0xafb   : > { %v889_v59 = vld [vmem:[#allocation3] sm:$0xff] }
 0xafc   : > { %975 = vrot.lane.b32.xlu1 %v889_v59, %s2194_s10  ;;  %v1273_v59 = vstv %s1164_s26  ;;  %s2813_s26 = smul.u32 4294967256, %s2175_s18 }
 0xafd   : > { %v854_v60 = vpop.permute.xlu0 %853  ;;  %vm1274_vm14 = vcmp.gt.s32.totalorder %v2441_v16, %v1273_v59 }
 0xafe   : > { %v2552_v62 = vmul.f32 %v1970_v46, %v854_v60  ;;  %s1598_s9 = scalar_lea.vmem %s2396_s7, %s2813_s26 [#allocation4] }
 0xb00   : > { %999 = vperm.xlu1 %1939, %v997_v61   ;;  %v867_v2 = vsel %vm863_vm9, %v2552_v62, %v865_v56 }
 0xb01   : > { %869 = vrot.lane.b32.xlu0 %v867_v2, %s2198_s22  ;;  %v1275_v2 = vsel %vm1274_vm14, 1, %v2192_v10 }
 0xb6e   : > { %v976_v19 = vpop.permute.xlu1 %975 }
 0xb73   : > { %v870_v3 = vpop.permute.xlu0 %869 }
 0xb74   : > { %872 = vst.msk [vmem:[#allocation2] sm:$0xff] %vm319_vm0, %v870_v3 }
 0xb7b   : > { %v888_v5 = vld [vmem:[#allocation2] sm:$0xff] }
 0xb7c   : > { %1002 = vrot.lane.b32.xlu1 %v888_v5, %s2195_s14  ;;  %1806 = vmatmul.mubr.msk.f32.vlgmr.msra.gmra.mrb[4].mxu0 %vm319_vm0, %v888_v5 }
 0xb7d   : > { %1849 = vmatpush3.bf16.msra.mxu0 %v2418_v4  ;;  %1819 = vmatprep.mubr.msk.f32.mxu0 %vm2190_vm1, %v2191_v1 }
 0xb7f   : > { %v2570_v21 = vpop.permute.xlu1 %999 }
 0xb80   : > { %vm1001_vm11 = vcmp.eq.s32.totalorder %v2570_v21, 1 }
 0xbee   : > { %v1003_v28 = vpop.permute.xlu1 %1002 }
 0xc4f   : > { %v962_v7 = vpop.f32.mrb[4].mxu0 }
 0xc50   : > { %v966_v8 = vadd.f32 %v962_v7, %v892_v6  ;;  %v1807_v9 = vpop.f32.mrb[5].mxu0 }
 0xc52   : > { %1973 = vtanh.f32 %v966_v8  ;;  %v1720_v12 = vmul.f32 -1.442695, %v966_v8  ;;  %v1728_v8 = vld [vmem:[%s1598_s9 + $0x30] sm:$0xff]  ;;  %s1302_s9 = smul.u32 4294967289, %s2175_s18 }
 0xc54   : > { %1975 = vpow2.f32 %v1720_v12  ;;  %s1303_s26 = sadd.s32 7, %s1302_s9  ;;  %s1733_s9 = smul.u32 4294967240, %s2175_s18 }
 0xc56   : > { %s1606_s21 = scalar_lea.vmem %s2396_s7, %s1733_s9 [#allocation4] }
 0xc5c   : > { %v1974_v11 = vpop.eup %1973 }
 0xc5d   : > { %980 = vrot.lane.b32.xlu0 %v1974_v11, %s2193_s11 }
 0xc5e   : > { %v1976_v13 = vpop.eup %1975 }
 0xc5f   : > { %v970_v14 = vadd.f32 1.0, %v1976_v13 }
 0xc61   : > { %1977 = vrcp.f32 %v970_v14 }
 0xc6b   : > { %v1978_v15 = vpop.eup %1977 }
 0xc6c   : > { %v978_v22 = vmul.f32 %v1978_v15, %v976_v19 }
 0xccf   : > { %v981_v17 = vpop.permute.xlu0 %980 }
 0xcd0   : > { %v983_v18 = vmul.f32 %v1978_v15, %v981_v17 }
 0xcd2   : > { %985 = vrot.lane.b32.xlu0 %v983_v18, %s2194_s10 }
 0xd44   : > { %v986_v23 = vpop.permute.xlu0 %985 }
 0xd45   : > { %v988_v24 = vadd.f32 %v986_v23, %v978_v22 }
 0xd47   : > { %1979 = vtanh.f32 %v988_v24  ;;  %v1011_v25 = vsel %vm1001_vm11, %v988_v24, %v976_v19 }
 0xd48   : > { %1013 = vrot.lane.b32.xlu1 %v1011_v25, %s2197_s13 }
 0xd51   : > { %v1980_v26 = vpop.eup %1979 }
 0xd52   : > { %991 = vrot.lane.b32.xlu0 %v1980_v26, %s2196_s12 }
 0xdba   : > { %v1014_v29 = vpop.permute.xlu1 %1013 }
 0xdbb   : > { %1016 = vst.msk [vmem:[#allocation3] sm:$0xff] %vm319_vm0, %v1014_v29 }
 0xdc2   : > { %v1028_v32 = vld [vmem:[#allocation3] sm:$0xff] }
 0xdc3   : > { %1114 = vrot.lane.b32.xlu1 %v1028_v32, %s2194_s10 }
 0xdc4   : > { %v992_v33 = vpop.permute.xlu0 %991 }
 0xdc5   : > { %v2582_v36 = vmul.f32 %v1978_v15, %v992_v33 }
 0xdc7   : > { %1138 = vperm.xlu1 %1939, %v1136_v35   ;;  %v1005_v37 = vsel %vm1001_vm11, %v2582_v36, %v1003_v28  ;;  %v1412_v35 = vstv %s1303_s26 }
 0xdc8   : > { %1007 = vrot.lane.b32.xlu0 %v1005_v37, %s2198_s22 }
 0xe35   : > { %v1115_v0 = vpop.permute.xlu1 %1114 }
 0xe3a   : > { %v1008_v38 = vpop.permute.xlu0 %1007 }
 0xe3b   : > { %1010 = vst.msk [vmem:[#allocation2] sm:$0xff] %vm319_vm0, %v1008_v38 }
 0xe42   : > { %v1027_v39 = vld [vmem:[#allocation2] sm:$0xff] }
 0xe43   : > { %1141 = vrot.lane.b32.xlu1 %v1027_v39, %s2195_s14  ;;  %1813 = vmatmul.mubr.msk.f32.vlgmr.msra.gmra.mrb[4].mxu1 %vm319_vm0, %v1027_v39 }
 0xe44   : > { %1852 = vmatpush3.bf16.msra.mxu1 %v2418_v4  ;;  %1826 = vmatprep.mubr.msk.f32.mxu1 %vm2190_vm1, %v2191_v1  ;;  %vm1413_vm1 = vcmp.gt.s32.totalorder %v2441_v16, %v1412_v35  ;;  %v741_v16 = vsel %vm725_vm7, %v2521_v34, 0.0  ;;  %v1734_v34 = vld [vmem:[%s1606_s21 + $0x38] sm:$0xff]  ;;  %s2826_s21 = smul.u32 4294967256, %s2175_s18 }
 0xe45   : > { %v1414_v39 = vsel %vm1413_vm1, 1, %v2192_v10  ;;  %v463_v10 = vsel %vm447_vm3, %v2454_v31, 0.0 }
 0xe46   : > { %v2600_v50 = vpop.permute.xlu1 %1138 }
 0xe47   : > { %vm1140_vm13 = vcmp.eq.s32.totalorder %v2600_v50, 1 }
 0xeb5   : > { %v1142_v57 = vpop.permute.xlu1 %1141 }
 0xf16   : > { %v1101_v41 = vpop.f32.mrb[4].mxu1 }
 0xf17   : > { %v1105_v42 = vadd.f32 %v1722_v40, %v1101_v41  ;;  %v1814_v43 = vpop.f32.mrb[5].mxu1 }
 0xf19   : > { %1981 = vtanh.f32 %v1105_v42  ;;  %v1724_v45 = vmul.f32 -1.442695, %v1105_v42 }
 0xf1b   : > { %1983 = vpow2.f32 %v1724_v45 }
 0xf23   : > { %v1982_v44 = vpop.eup %1981 }
 0xf24   : > { %1119 = vrot.lane.b32.xlu0 %v1982_v44, %s2193_s11  ;;  %v1017_v44 = vsel %vm1001_vm11, %v2582_v36, 0.0 }
 0xf25   : > { %v1984_v46 = vpop.eup %1983 }
 0xf26   : > { %v1109_v47 = vadd.f32 1.0, %v1984_v46 }
 0xf28   : > { %1985 = vrcp.f32 %v1109_v47 }
 0xf32   : > { %v1986_v4 = vpop.eup %1985 }
 0xf33   : > { %v1117_v52 = vmul.f32 %v1986_v4, %v1115_v0 }
 0xf96   : > { %v1120_v48 = vpop.permute.xlu0 %1119 }
 0xf97   : > { %v1122_v1 = vmul.f32 %v1986_v4, %v1120_v48 }
 0xf99   : > { %1124 = vrot.lane.b32.xlu0 %v1122_v1, %s2194_s10 }
0x100b   : > { %v1125_v53 = vpop.permute.xlu0 %1124 }
0x100c   : > { %v1127_v54 = vadd.f32 %v1125_v53, %v1117_v52 }
0x100e   : > { %1987 = vtanh.f32 %v1127_v54  ;;  %v1150_v55 = vsel %vm1140_vm13, %v1127_v54, %v1115_v0 }
0x100f   : > { %1152 = vrot.lane.b32.xlu1 %v1150_v55, %s2197_s13 }
0x1018   : > { %v1988_v56 = vpop.eup %1987 }
0x1019   : > { %1130 = vrot.lane.b32.xlu0 %v1988_v56, %s2196_s12 }
0x1081   : > { %v1153_v58 = vpop.permute.xlu1 %1152 }
0x1082   : > { %1155 = vst.msk [vmem:[#allocation3] sm:$0xff] %vm319_vm0, %v1153_v58 }
0x1089   : > { %v1167_v60 = vld [vmem:[#allocation3] sm:$0xff] }
0x108a   : > { %1253 = vrot.lane.b32.xlu1 %v1167_v60, %s2194_s10  ;;  %v602_v60 = vsel %vm586_vm5, %v2490_v63, 0.0 }
0x108b   : > { %v1131_v61 = vpop.permute.xlu0 %1130 }
0x108c   : > { %v2612_v3 = vmul.f32 %v1986_v4, %v1131_v61  ;;  %v879_v61 = vsel %vm863_vm9, %v2552_v62, 0.0 }
0x108e   : > { %1277 = vperm.xlu1 %1939, %v1275_v2   ;;  %v1144_v5 = vsel %vm1140_vm13, %v2612_v3, %v1142_v57 }
0x108f   : > { %1146 = vrot.lane.b32.xlu0 %v1144_v5, %s2198_s22 }
0x10fc   : > { %v1254_v23 = vpop.permute.xlu1 %1253 }
0x1101   : > { %v1147_v6 = vpop.permute.xlu0 %1146 }
0x1102   : > { %1149 = vst.msk [vmem:[#allocation2] sm:$0xff] %vm319_vm0, %v1147_v6 }
0x1109   : > { %v1166_v7 = vld [vmem:[#allocation2] sm:$0xff] }
0x110a   : > { %1280 = vrot.lane.b32.xlu1 %v1166_v7, %s2195_s14  ;;  %1820 = vmatmul.mubr.msk.f32.vlgmr.msra.gmra.mrb[6].mxu0 %vm319_vm0, %v1166_v7 }
0x110d   : > { %v1278_v24 = vpop.permute.xlu1 %1277 }
0x110e   : > { %vm1279_vm15 = vcmp.eq.s32.totalorder %v1278_v24, 1 }
0x117c   : > { %v1281_v32 = vpop.permute.xlu1 %1280 }
0x11dd   : > { %v1240_v9 = vpop.f32.mrb[6].mxu0 }
0x11de   : > { %v1244_v11 = vadd.f32 %v1728_v8, %v1240_v9  ;;  %v1821_v12 = vpop.f32.mrb[7].mxu0  ;;  %v1156_v8 = vsel %vm1140_vm13, %v2612_v3, 0.0 }
0x11e0   : > { %1989 = vtanh.f32 %v1244_v11  ;;  %v1730_v14 = vmul.f32 -1.442695, %v1244_v11 }
0x11e2   : > { %1991 = vpow2.f32 %v1730_v14 }
0x11ea   : > { %v1990_v13 = vpop.eup %1989 }
0x11eb   : > { %1258 = vrot.lane.b32.xlu0 %v1990_v13, %s2193_s11 }
0x11ec   : > { %v1992_v15 = vpop.eup %1991 }
0x11ed   : > { %v1248_v17 = vadd.f32 1.0, %v1992_v15 }
0x11ef   : > { %1993 = vrcp.f32 %v1248_v17 }
0x11f9   : > { %v1994_v18 = vpop.eup %1993 }
0x11fa   : > { %v1256_v25 = vmul.f32 %v1994_v18, %v1254_v23 }
0x125d   : > { %v1259_v19 = vpop.permute.xlu0 %1258 }
0x125e   : > { %v1261_v22 = vmul.f32 %v1994_v18, %v1259_v19 }
0x1260   : > { %1263 = vrot.lane.b32.xlu0 %v1261_v22, %s2194_s10 }
0x12d2   : > { %v1264_v26 = vpop.permute.xlu0 %1263 }
0x12d3   : > { %v1266_v28 = vadd.f32 %v1264_v26, %v1256_v25 }
0x12d5   : > { %1995 = vtanh.f32 %v1266_v28  ;;  %v1289_v29 = vsel %vm1279_vm15, %v1266_v28, %v1254_v23 }
0x12d6   : > { %1291 = vrot.lane.b32.xlu1 %v1289_v29, %s2197_s13 }
0x12df   : > { %v1996_v30 = vpop.eup %1995 }
0x12e0   : > { %1269 = vrot.lane.b32.xlu0 %v1996_v30, %s2196_s12 }
0x1348   : > { %v1292_v33 = vpop.permute.xlu1 %1291 }
0x1349   : > { %1294 = vst.msk [vmem:[#allocation3] sm:$0xff] %vm319_vm0, %v1292_v33 }
0x1350   : > { %v1306_v37 = vld [vmem:[#allocation3] sm:$0xff] }
0x1351   : > { %1392 = vrot.lane.b32.xlu1 %v1306_v37, %s2194_s10 }
0x1352   : > { %v1270_v38 = vpop.permute.xlu0 %1269 }
0x1353   : > { %v1272_v40 = vmul.f32 %v1994_v18, %v1270_v38 }
0x1355   : > { %1416 = vperm.xlu1 %1939, %v1414_v39   ;;  %v1283_v41 = vsel %vm1279_vm15, %v1272_v40, %v1281_v32  ;;  %v1295_v27 = vsel %vm1279_vm15, %v1272_v40, 0.0 }
0x1356   : > { %1285 = vrot.lane.b32.xlu0 %v1283_v41, %s2198_s22 }
0x13c3   : > { %v1393_v31 = vpop.permute.xlu1 %1392 }
0x13c8   : > { %v1286_v42 = vpop.permute.xlu0 %1285 }
0x13c9   : > { %1288 = vst.msk [vmem:[#allocation2] sm:$0xff] %vm319_vm0, %v1286_v42 }
0x13d0   : > { %v1305_v43 = vld [vmem:[#allocation2] sm:$0xff] }
0x13d1   : > { %1419 = vrot.lane.b32.xlu1 %v1305_v43, %s2195_s14  ;;  %1827 = vmatmul.mubr.msk.f32.vlgmr.msra.gmra.mrb[6].mxu1 %vm319_vm0, %v1305_v43  ;;  %s2656_s14 = scalar_lea.vmem [#allocation9], %s1693_s6 }
0x13d2   : > { %s468_s26 = scalar_lea.vmem %s2656_s14, %s1697_s27 [#allocation9]  ;;  %s1568_s6 = scalar_lea.vmem %s2656_s14, %s1700_s8 [#allocation9] }
0x13d3   : > { %s1576_s7 = scalar_lea.vmem %s2656_s14, %s1706_s5 [#allocation9]  ;;  %s2824_s27 = sshll.u32 %s2175_s18, 3 }
0x13d4   : > { %v1417_v45 = vpop.permute.xlu1 %1416  ;;  %s2825_s8 = smul.u32 4294967272, %s2175_s18 }
0x13d5   : > { %465 = vrot.lane.b32.xlu1 %v463_v10, %s2198_s22  ;;  %vm1418_vm2 = vcmp.eq.s32.totalorder %v1417_v45, 1 }
0x13d6   : > { %s1594_s5 = scalar_lea.vmem %s2656_s14, %s2825_s8 [#allocation9] }
0x13d9   : > { %743 = vrot.lane.b32.xlu1 %v741_v16, %s2198_s22 }
0x13dd   : > { %1019 = vrot.lane.b32.xlu1 %v1017_v44, %s2198_s22 }
0x13e1   : > { %1297 = vrot.lane.b32.xlu1 %v1295_v27, %s2198_s22 }
0x1443   : > { %v1420_v46 = vpop.permute.xlu1 %1419 }
0x1447   : > { %v466_v20 = vpop.permute.xlu1 %465 }
0x1448   : > { %469 = vst.msk [vmem:[%s468_s26] sm:$0xff] %vm319_vm0, %v466_v20  ;;  %s1748_s26 = sshll.u32 %s2175_s18, 10 }
0x1449   : > { %s2724_s8 = scalar_lea.hbm %s2807_s3, %s1748_s26 }
0x144b   : > { %v744_v2 = vpop.permute.xlu1 %743 }
0x144f   : > { %v1020_v5 = vpop.permute.xlu1 %1019 }
0x1453   : > { %v1298_v6 = vpop.permute.xlu1 %1297 }
0x14a4   : > { %v1379_v21 = vpop.f32.mrb[6].mxu1 }
0x14a5   : > { %v1383_v36 = vadd.f32 %v1734_v34, %v1379_v21  ;;  %v1828_v47 = vpop.f32.mrb[7].mxu1 }
0x14a7   : > { %1997 = vtanh.f32 %v1383_v36  ;;  %v1736_v48 = vmul.f32 -1.442695, %v1383_v36 }
0x14a9   : > { %1999 = vpow2.f32 %v1736_v48 }
0x14b1   : > { %v1998_v4 = vpop.eup %1997 }
0x14b2   : > { %1397 = vrot.lane.b32.xlu0 %v1998_v4, %s2193_s11  ;;  %s1582_s11 = scalar_lea.vmem %s2656_s14, %s2824_s27 [#allocation9] }
0x14b3   : > { %v2000_v1 = vpop.eup %1999 }
0x14b4   : > { %v1387_v0 = vadd.f32 1.0, %v2000_v1 }
0x14b6   : > { %2001 = vrcp.f32 %v1387_v0 }
0x14c0   : > { %v2002_v52 = vpop.eup %2001 }
0x14c1   : > { %v1395_v55 = vmul.f32 %v2002_v52, %v1393_v31 }
0x1524   : > { %v1398_v53 = vpop.permute.xlu0 %1397 }
0x1525   : > { %v1400_v54 = vmul.f32 %v2002_v52, %v1398_v53 }
0x1527   : > { %1402 = vrot.lane.b32.xlu0 %v1400_v54, %s2194_s10  ;;  %s1022_s10 = scalar_lea.vmem %s2656_s14, %s2564_s24 [#allocation9]  ;;  %s1602_s24 = scalar_lea.vmem %s2656_s14, %s2826_s21 [#allocation9] }
0x1599   : > { %v1403_v56 = vpop.permute.xlu0 %1402 }
0x159a   : > { %v1405_v57 = vadd.f32 %v1403_v56, %v1395_v55 }
0x159c   : > { %2003 = vtanh.f32 %v1405_v57  ;;  %v1428_v58 = vsel %vm1418_vm2, %v1405_v57, %v1393_v31 }
0x159d   : > { %1430 = vrot.lane.b32.xlu1 %v1428_v58, %s2197_s13  ;;  %s1696_s13 = sshll.u32 %s2390_s25, 3 }
0x15a6   : > { %v2004_v59 = vpop.eup %2003 }
0x15a7   : > { %1408 = vrot.lane.b32.xlu0 %v2004_v59, %s2196_s12  ;;  %s1471_s12 = sshll.u32 %s2656_s14, 4  ;;  %s2705_s12 = int_to_ptr.vmem [resolvable:$true] %s1471_s12 }
0x15ab   : > { %604 = vrot.lane.b32.xlu0 %v602_v60, %s2198_s22 }
0x15af   : > { %881 = vrot.lane.b32.xlu0 %v879_v61, %s2198_s22 }
0x160f   : > { %v1431_v7 = vpop.permute.xlu1 %1430 }
0x1610   : > { %1433 = vst.msk [vmem:[#allocation3] sm:$0xff] %vm319_vm0, %v1431_v7 }
0x1619   : > { %v1409_v51 = vpop.permute.xlu0 %1408 }
0x161a   : > { %v1411_v63 = vmul.f32 %v2002_v52, %v1409_v51 }
0x161c   : > { %v1422_v49 = vsel %vm1418_vm2, %v1411_v63, %v1420_v46  ;;  %v1434_v11 = vsel %vm1418_vm2, %v1411_v63, 0.0 }
0x161d   : > { %1424 = vrot.lane.b32.xlu0 %v1422_v49, %s2198_s22  ;;  %v605_v62 = vpop.permute.xlu0 %604 }
0x161e   : > { %1705 = vst.msk [vmem:[%s1568_s6 + $0x8] sm:$0xff] %vm319_vm0, %v605_v62  ;;  %s1610_s6 = scalar_lea.vmem %s2656_s14, %s1733_s9 [#allocation9] }
0x161f   : > { %1711 = vst.msk [vmem:[%s1576_s7 + $0x10] sm:$0xff] %vm319_vm0, %v744_v2  ;;  %s304_s7 = scalar_lea.vmem [#allocation10], %s1696_s13  ;;  %s2065_s13 = scalar_lea.vmem %s2705_s12, 1024 }
0x1620   : > { %s1487_s27 = sshll.u32 %s304_s7, 4  ;;  %p2066_p0 = scmp.ne.s32.totalorder %s2705_s12, %s2065_s13  ;;  %s2731_s27 = int_to_ptr.vmem [resolvable:$true] %s1487_s27 }
0x1621   : > { %1158 = vrot.lane.b32.xlu0 %v1156_v8, %s2198_s22  ;;  %v882_v9 = vpop.permute.xlu0 %881 }
0x1622   : > { %1717 = vst.msk [vmem:[%s1582_s11 + $0x18] sm:$0xff] %vm319_vm0, %v882_v9  ;;  %p2067_p12 = pnand %p2066_p0, %p2827_p3 }
0x1623   : > { %1023 = vst.msk [vmem:[%s1022_s10] sm:$0xff] %vm319_vm0, %v1020_v5 }
0x1624   : > { %p2068_p13 = pneg %p2067_p12 }
0x1625   : > { %1436 = vrot.lane.b32.xlu0 %v1434_v11, %s2198_s22  ;;  %s1743_s22 = sshll.u32 %s2175_s18, 7  ;;  %s1447_s18 = scalar_lea.sflag [#allocation6], %s2390_s25 }
0x1626   : > { %s2729_s9 = scalar_lea.hbm %s2808_s4, %s1743_s22 }
0x168f   : > { %v1425_v12 = vpop.permute.xlu0 %1424 }
0x1690   : > { %1427 = vst.msk [vmem:[#allocation2] sm:$0xff] %vm319_vm0, %v1425_v12 }
0x1693   : > { %v1159_v50 = vpop.permute.xlu0 %1158 }
0x1694   : > { %1726 = vst.msk [vmem:[%s1594_s5 + $0x28] sm:$0xff] %vm319_vm0, %v1159_v50  ;;  %s2199_s5 = smov [#allocation9]  }
0x1695   : > { %1732 = vst.msk [vmem:[%s1602_s24 + $0x30] sm:$0xff] %vm319_vm0, %v1298_v6  ;;  %s2069_s24 = sshll.u32 %s2199_s5, 4  ;;  %s2070_s24 = int_to_ptr.vmem [resolvable:$false] %s2069_s24 }
0x1696   : > { %s2071_s26 = scalar_lea.vmem %s2070_s24, 2048  ;;  %p2072_p7 = scmp.lt.s32.totalorder %s2705_s12, %s2070_s24 }
0x1697   : > { %v1437_v3 = vpop.permute.xlu0 %1436  ;;  %v1444_v13 = vld [vmem:[#allocation2] sm:$0xff]  ;;  %p2073_p10 = scmp.lt.s32.totalorder %s2071_s26, %s2065_s13 }
0x1698   : > { %1738 = vst.msk [vmem:[%s1610_s6 + $0x38] sm:$0xff] %vm319_vm0, %v1437_v3  ;;  %1445 = vst.msk [vmem:[%s304_s7] sm:$0xff] %vm319_vm0, %v1444_v13 }
0x1699   : > { %p2074_p9 = por %p2073_p10, %p2072_p7 }
0x169b   : > { %p2075_p11 = pnand %p2074_p9, %p2068_p13 }
0x169d   : > { %2078 = shalt.err (!%p2075_p11)
}
0x169e   : > { %s2079_s6 = scalar_lea.hbm %s2724_s8, 1024  ;;  %s2083_s11 = scalar_lea.hbm %s2807_s3, 2048 }
0x169f   : > { %p2080_p1 = scmp.ne.s32.totalorder %s2724_s8, %s2079_s6  ;;  %p2084_p5 = scmp.lt.u32.totalorder %s2724_s8, %s2807_s3 }
0x16a0   : > { %p2085_p4 = scmp.lt.u32.totalorder %s2083_s11, %s2079_s6  ;;  %p2087_p0 = scmp.lt.u32.totalorder %s2079_s6, %s2724_s8 }
0x16a1   : > { %p2081_p6 = pnand %p2080_p1, %p2827_p3 }
0x16a2   : > { %p2086_p8 = por %p2085_p4, %p2084_p5 }
0x16a3   : > { %p2082_p2 = pneg %p2081_p6 }
0x16a4   : > { %p2088_p12 = por %p2087_p0, %p2086_p8 }
0x16a6   : > { %p2089_p13 = pnand %p2088_p12, %p2082_p2 }
0x16a8   : > { %2092 = shalt.err (!%p2089_p13)
}
0x16a9   : > { %s2200_s14 = smov 128   ;;  %s2201_s13 = smov 8  }
0x16aa   : > { %1857 = dma.vmem_to_hbm [thread:$0]  (%p2827_p3), %s2705_s12, 1024, %s2724_s8, %s1447_s18, %s2200_s14, %s2200_s14, %s2201_s13  }
0x16ab   : > { %s1452_s5 = scalar_lea.sflag [#allocation11], %s2390_s25  ;;  %s2093_s24 = scalar_lea.vmem %s2731_s27, 128 }
0x16ac   : > { %p2094_p7 = scmp.ne.s32.totalorder %s2731_s27, %s2093_s24  ;;  %s2202_s26 = smov [#allocation10]  }
0x16ad   : > { %s2097_s6 = sshll.u32 %s2202_s26, 4  ;;  %s2098_s6 = int_to_ptr.vmem [resolvable:$false] %s2097_s6 }
0x16ae   : > { %p2095_p10 = pnand %p2094_p7, %p2827_p3  ;;  %s2099_s22 = scalar_lea.vmem %s2098_s6, 256 }
0x16af   : > { %p2100_p11 = scmp.lt.s32.totalorder %s2731_s27, %s2098_s6  ;;  %p2101_p1 = scmp.lt.s32.totalorder %s2099_s22, %s2093_s24 }
0x16b0   : > { %p2096_p9 = pneg %p2095_p10 }
0x16b1   : > { %p2102_p6 = por %p2101_p1, %p2100_p11 }
0x16b3   : > { %p2103_p2 = pnand %p2102_p6, %p2096_p9 }
0x16b5   : > { %2106 = shalt.err (!%p2103_p2)
}
0x16b6   : > { %s2107_s25 = scalar_lea.hbm %s2729_s9, 128  ;;  %s2111_s18 = scalar_lea.hbm %s2808_s4, 256 }
0x16b7   : > { %p2108_p5 = scmp.ne.s32.totalorder %s2729_s9, %s2107_s25  ;;  %p2112_p0 = scmp.lt.u32.totalorder %s2729_s9, %s2808_s4 }
0x16b8   : > { %p2113_p12 = scmp.lt.u32.totalorder %s2111_s18, %s2107_s25  ;;  %p2115_p7 = scmp.lt.u32.totalorder %s2107_s25, %s2729_s9 }
0x16b9   : > { %p2109_p4 = pnand %p2108_p5, %p2827_p3 }
0x16ba   : > { %p2114_p13 = por %p2113_p12, %p2112_p0 }
0x16bb   : > { %p2110_p8 = pneg %p2109_p4 }
0x16bc   : > { %p2116_p10 = por %p2115_p7, %p2114_p13 }
0x16be   : > { %p2117_p9 = pnand %p2116_p10, %p2110_p8 }
0x16c0   : > { %2120 = shalt.err (!%p2117_p9)
}
0x16c1   : > { %1858 = dma.vmem_to_hbm [thread:$0]  (%p2827_p3), %s2731_s27, 128, %s2729_s9, %s1452_s5  }
0x16c2 PF: > { %s1499_s10 = sand.u32 1, %s2163_s15   ;;  %p2828_p11 = scmp.ne.s32.totalorder %s2818_s30, 0 }
0x16c3   : > { %p2829_p1 = scmp.ge.s32.totalorder %s2183_s20, 2  ;;  %s1500_s21 = scalar_lea.sflag [#allocation6], %s1499_s10 }
0x16c5   : > { %p1869_p6 = pnand %p2829_p1, %p2828_p11 }
0x16c7   : > { %2154 = dma.done.wait (!%p1869_p6), %s1500_s21, 1024  }
0x16c8   : > { %2156 = vsyncadd (!%p1869_p6), %s1500_s21, 4294966272  ;;  %s1509_s14 = scalar_lea.sflag [#allocation11], %s1499_s10 }
0x16c9   : > { %2158 = dma.done.wait (!%p1869_p6), %s1509_s14, 128  }
0x16ca   : > { %2160 = vsyncadd (!%p1869_p6), %s1509_s14, 4294967168  ;;  %s27_s20 = sadd.s32 1, %s2183_s20   ;;  %s2830_s15 = smov %s2167_s16 }
0x16cb   : > { %p24_p2 = scmp.ge.s32.totalorder %s27_s20, 4   ;;  %s2831_s16 = smov %s2171_s17 }
0x16cc   : > { %s2832_s17 = smov %s2284_s29  ;;  %s2833_s18 = smov %s2179_s19 }
0x16cd   : > { %s2834_s19 = smov %s2836_s23  ;;  %26 = sbr.rel (!%p24_p2) target bundleno = 10 (0xa), region = 131 }
0x16d4   :  { %1514 = vsyncpa [#allocation5], 1 }
0x16d5   :  { %1516 = vsyncpa [#allocation5 + $0x1], 1 }
0x16d6   :  { %1517 = vsyncpa [#allocation8], 1 }
0x16d7   :  { %1519 = vsyncpa [#allocation8 + $0x1], 1 }
0x16d8   :  { %1520 = vsyncpa [#allocation6], 1 }
0x16d9   :  { %1522 = vsyncpa [#allocation6 + $0x1], 1 }
0x16da   :  { %1523 = vsyncpa [#allocation11], 1 }
0x16db   :  { %1525 = vsyncpa [#allocation11 + $0x1], 1 }

</bundles_post_ra>
